<compile_context>
chip_gen: v7x
topology: tpu7x:2x2x1
jax: 0.10.0
libtpu: 0.0.40
codegen_flags: <defaults>
</compile_context>

<pallas_src>
import functools

import jax
import jax.numpy as jnp
import numpy as np
from jax import lax
from jax.experimental import pallas as pl
from jax.experimental.pallas import tpu as pltpu

EPS = 1e-5
LANE = 128


def _round_up(x, m):
    return ((x + m - 1) // m) * m


# ----------------------------------------------------------------------------
# Generation-aware VMEM sizing (v5e/v6e: 128 MiB, v7x: 64 MiB per TensorCore).
# ----------------------------------------------------------------------------
def _vmem_config():
    try:
        phys = int(pltpu.get_tpu_info().vmem_capacity_bytes)
    except Exception:
        phys = 64 << 20                       # conservative default (v7x per-core VMEM)
    limit = min((phys * 3) // 4, 100 << 20)   # explicit scoped-VMEM limit
    budget = min(phys // 3, 48 << 20)         # double-buffered tile working set target
    return limit, budget


VMEM_LIMIT, VMEM_TILE_BUDGET = _vmem_config()


def _num_tensorcores():
    # Megacore chips (2 TensorCores) can shard a "parallel" grid axis across cores.
    try:
        n = int(getattr(jax.devices()[0], "num_cores", 1))
    except Exception:
        n = 1
    return 2 if n >= 2 else 1


NUM_TENSORCORES = _num_tensorcores()


# ----------------------------------------------------------------------------
# Pallas kernels
# ----------------------------------------------------------------------------
def _conv3x3_kernel(*refs, Ho, Wo, input_bn):
    """Fused 3x3 stride-1 conv with per-channel BN statistics.

    Grid = (cout_blocks [parallel], N [arbitrary]).  Per step the whole padded sample
    slab (Hp, Wp, Cin) sits in VMEM; each output row is produced by 9 accumulating
    bf16 MXU dots into an f32 accumulator.  Stats outputs are resident (1, tn) blocks
    accumulated across the batch axis.  With `input_bn`, BN1 scale/shift + ReLU are
    applied to every tap slice (the padding ring is re-masked to zero, since
    relu(0*scale+shift) != 0).
    """
    if input_bn:
        x_ref, w_ref, sc_ref, sh_ref, y_ref, s_ref, ss_ref = refs
    else:
        x_ref, w_ref, y_ref, s_ref, ss_ref = refs
        sc_ref = sh_ref = None

    tn = s_ref.shape[1]

    @pl.when(pl.program_id(1) == 0)
    def _():
        s_ref[...] = jnp.zeros_like(s_ref)
        ss_ref[...] = jnp.zeros_like(ss_ref)

    if input_bn:
        sc = sc_ref[...]                                   # (1, Cin) f32
        sh = sh_ref[...]
        col_ids = lax.broadcasted_iota(jnp.int32, (Wo, 1), 0)
        # interior columns of the padded slab are 1 .. Wo (ring is 0 and Wo+1)
        col_valid = [(col_ids + dw >= 1) & (col_ids + dw <= Wo) for dw in range(3)]

    def row_body(r, carry):
        acc = jnp.zeros((Wo, tn), jnp.float32)
        for dh in range(3):
            h = r + dh
            for dw in range(3):
                a = x_ref[h, pl.ds(dw, Wo), :]             # (Wo, Cin) bf16
                if input_bn:
                    row_ok = (h >= 1) & (h <= Ho)          # interior rows are 1 .. Ho
                    av = jnp.maximum(a.astype(jnp.float32) * sc + sh, 0.0)
                    av = jnp.where(col_valid[dw] & row_ok, av, 0.0)
                    a = av.astype(jnp.bfloat16)
                acc += jnp.dot(a, w_ref[dh * 3 + dw],
                               preferred_element_type=jnp.float32)
        y_ref[r] = acc.astype(y_ref.dtype)
        s_ref[...] += jnp.sum(acc, axis=0, keepdims=True)
        ss_ref[...] += jnp.sum(acc * acc, axis=0, keepdims=True)
        return carry
        # TODO(synk): flatten several output rows per dot (bigger MXU M) once a safe
        # in-kernel (rows, Wo, C) -> (rows*Wo, C) collapse is in place.

    lax.fori_loop(0, Ho, row_body, 0)


def _matmul_stats_kernel(a_ref, w_ref, y_ref, s_ref, ss_ref):
    """y = a @ w (bf16 operands, f32 accumulate, bf16 store) + per-channel stats.

    Used for the strided conv1 fallback (bf16 im2col) and the 1x1 shortcut conv.
    Stats blocks stay resident across the (arbitrary, innermost) M axis.
    """
    @pl.when(pl.program_id(1) == 0)
    def _():
        s_ref[...] = jnp.zeros_like(s_ref)
        ss_ref[...] = jnp.zeros_like(ss_ref)

    y = jnp.dot(a_ref[...], w_ref[...], preferred_element_type=jnp.float32)
    y_ref[...] = y.astype(y_ref.dtype)
    s_ref[...] += jnp.sum(y, axis=0, keepdims=True)
    ss_ref[...] += jnp.sum(y * y, axis=0, keepdims=True)


def _tail_kernel(*refs, has_shortcut):
    """relu(BN2(c2) + BN_shortcut(identity))  (or relu(BN2(c2) + identity))."""
    if has_shortcut:
        y_ref, sc_ref, sh_ref, id_ref, scs_ref, shs_ref, o_ref = refs
        res = id_ref[...].astype(jnp.float32) * scs_ref[...] + shs_ref[...]
    else:
        y_ref, sc_ref, sh_ref, id_ref, o_ref = refs
        res = id_ref[...].astype(jnp.float32)
    main = y_ref[...].astype(jnp.float32) * sc_ref[...] + sh_ref[...]
    o_ref[...] = jnp.maximum(main + res, 0.0).astype(o_ref.dtype)


# ----------------------------------------------------------------------------
# Pallas wrappers
# ----------------------------------------------------------------------------
def _fused_conv_fits(hp, wp, cin, ho, wo, tn):
    need = (2 * hp * wp * cin * 2       # bf16 input slab, double-buffered
            + 2 * 9 * cin * tn * 2      # bf16 weight taps (TODO(synk): pl.Buffered(1))
            + 2 * ho * wo * tn * 2      # bf16 output block, double-buffered
            + 2 * wo * tn * 4           # f32 row accumulator + slack
            + 8 * tn * 4)
    return need <= VMEM_TILE_BUDGET


def conv3x3_fused_stats(x, w_taps, bn_scale=None, bn_shift=None, *, n_co=1):
    """x (N, H, W, Cin) bf16, stride-1 pad-1 3x3 conv -> (N, H, W, Cp) bf16 + stats."""
    N, H, W, Cin = x.shape
    Ho, Wo, Hp, Wp = H, W, H + 2, W + 2
    Cp = w_taps.shape[2]
    tn = Cp // n_co
    input_bn = bn_scale is not None
    xp = jnp.pad(x, ((0, 0), (1, 1), (1, 1), (0, 0)))

    in_specs = [
        pl.BlockSpec((None, Hp, Wp, Cin), lambda c, n: (n, 0, 0, 0)),
        pl.BlockSpec((9, Cin, tn), lambda c, n: (0, 0, c)),
    ]
    args = [xp, w_taps]
    if input_bn:
        in_specs += [pl.BlockSpec((1, Cin), lambda c, n: (0, 0)),
                     pl.BlockSpec((1, Cin), lambda c, n: (0, 0))]
        args += [bn_scale, bn_shift]

    kernel = functools.partial(_conv3x3_kernel, Ho=Ho, Wo=Wo, input_bn=input_bn)
    return pl.pallas_call(
        kernel,
        out_shape=(jax.ShapeDtypeStruct((N, Ho, Wo, Cp), jnp.bfloat16),
                   jax.ShapeDtypeStruct((1, Cp), jnp.float32),
                   jax.ShapeDtypeStruct((1, Cp), jnp.float32)),
        grid=(n_co, N),
        in_specs=in_specs,
        out_specs=(pl.BlockSpec((None, Ho, Wo, tn), lambda c, n: (n, 0, 0, c)),
                   pl.BlockSpec((1, tn), lambda c, n: (0, c)),
                   pl.BlockSpec((1, tn), lambda c, n: (0, c))),
        compiler_params=pltpu.CompilerParams(
            dimension_semantics=("parallel", "arbitrary"),
            vmem_limit_bytes=VMEM_LIMIT),
    )(*args)


def _choose_tm(k, cp, m):
    """Largest power-of-two row tile (multiple of 16) whose working set fits budget."""
    best, tm = 16, 16
    while tm <= 2048:
        need = (2 * tm * k * 2        # bf16 A tiles (double-buffered)
                + 2 * tm * cp * 2     # bf16 y tiles (double-buffered)
                + 2 * k * cp * 2      # bf16 weight block (2 buffers assumed)
                + 8 * cp * 4)
        if need <= VMEM_TILE_BUDGET:
            best = tm
        tm *= 2
    # TODO(synk): K grid axis ("arbitrary" + f32 scratch accumulator) for very large K
    # on v5e so tm can stay large when K = 9*512.
    return min(best, _round_up(m, 16))


def conv_matmul_stats(a, w, *, tm, tn):
    """a (Mp, K) bf16 @ w (K, Cp) bf16 -> y (Mp, Cp) bf16 + (1, Cp) sum & sumsq (f32)."""
    Mp, K = a.shape
    Cp = w.shape[1]
    return pl.pallas_call(
        _matmul_stats_kernel,
        out_shape=(jax.ShapeDtypeStruct((Mp, Cp), jnp.bfloat16),
                   jax.ShapeDtypeStruct((1, Cp), jnp.float32),
                   jax.ShapeDtypeStruct((1, Cp), jnp.float32)),
        grid=(Cp // tn, Mp // tm),
        in_specs=[pl.BlockSpec((tm, K), lambda c, i: (i, 0)),
                  pl.BlockSpec((K, tn), lambda c, i: (0, c))],
        out_specs=(pl.BlockSpec((tm, tn), lambda c, i: (i, c)),
                   pl.BlockSpec((1, tn), lambda c, i: (0, c)),
                   pl.BlockSpec((1, tn), lambda c, i: (0, c))),
        compiler_params=pltpu.CompilerParams(
            dimension_semantics=("parallel", "arbitrary"),
            vmem_limit_bytes=VMEM_LIMIT),
    )(a, w)


def bn_add_relu(c2, sc2, sh2, identity, scs=None, shs=None):
    """Fused tail, per-sample blocks: relu(BN2(c2) + [BN_shortcut](identity))."""
    N, Ho, Wo, Cp = c2.shape
    has_shortcut = scs is not None
    blk = pl.BlockSpec((1, Ho, Wo, Cp), lambda n: (n, 0, 0, 0))
    vec = pl.BlockSpec((1, Cp), lambda n: (0, 0))
    in_specs = [blk, vec, vec, blk] + ([vec, vec] if has_shortcut else [])
    args = [c2, sc2, sh2, identity] + ([scs, shs] if has_shortcut else [])
    return pl.pallas_call(
        functools.partial(_tail_kernel, has_shortcut=has_shortcut),
        out_shape=jax.ShapeDtypeStruct((N, Ho, Wo, Cp), jnp.bfloat16),
        grid=(N,),
        in_specs=in_specs,
        out_specs=blk,
        compiler_params=pltpu.CompilerParams(
            dimension_semantics=("parallel",), vmem_limit_bytes=VMEM_LIMIT),
    )(*args)


# ----------------------------------------------------------------------------
# Glue: weights, bf16 im2col fallback, BN fold (plain JAX)
# ----------------------------------------------------------------------------
def conv3x3_weight_taps(w, cin_p, cout_p):
    """torch (Cout, Cin, 3, 3) -> (9, cin_p, cout_p) bf16, tap index = dh*3 + dw."""
    co, ci, kh, kw = w.shape
    wt = jnp.transpose(w, (2, 3, 1, 0)).reshape(kh * kw, ci, co)
    wt = jnp.pad(wt, ((0, 0), (0, cin_p - ci), (0, cout_p - co)))
    return wt.astype(jnp.bfloat16)


def conv1x1_weight_matrix(w, kp, cout_p):
    co, ci, _, _ = w.shape
    wm = jnp.transpose(w[:, :, 0, 0], (1, 0))
    return jnp.pad(wm, ((0, kp - ci), (0, cout_p - co))).astype(jnp.bfloat16)


def extract_patches_nhwc(x, stride, kp):
    """bf16 im2col for a 3x3 pad-1 conv (fallback path only)."""
    N, H, W, C = x.shape
    xp = jnp.pad(x, ((0, 0), (1, 1), (1, 1), (0, 0)))
    Ho = (H - 1) // stride + 1
    Wo = (W - 1) // stride + 1
    cols = [xp[:, dh:dh + stride * Ho:stride, dw:dw + stride * Wo:stride, :]
            for dh in range(3) for dw in range(3)]
    patches = jnp.concatenate(cols, axis=-1).reshape(N * Ho * Wo, 9 * C)
    if kp > 9 * C:
        patches = jnp.pad(patches, ((0, 0), (0, kp - 9 * C)))
    return patches, (N, Ho, Wo)


def conv3x3_im2col_stats(x, w_torch, stride, cout_p, n_co):
    """Fallback: bf16 im2col + matmul kernel (strided conv1 / oversized slabs)."""
    C = x.shape[3]
    kp = _round_up(9 * C, LANE)
    patches, (n, ho, wo) = extract_patches_nhwc(x, stride, kp)
    m = n * ho * wo
    tm = _choose_tm(kp, cout_p, m)
    mp = _round_up(m, tm)
    patches = jnp.pad(patches, ((0, mp - m), (0, 0)))        # zero rows: stats unaffected
    wmat = conv3x3_weight_taps(w_torch, C, cout_p).reshape(9 * C, cout_p)
    wmat = jnp.pad(wmat, ((0, kp - 9 * C), (0, 0)))
    y, s, ss = conv_matmul_stats(patches, wmat, tm=tm, tn=cout_p // n_co)
    return y[:m].reshape(n, ho, wo, cout_p), s, ss


def conv3x3_stats(x, w_torch, stride, cout_p, n_co, bn_scale=None, bn_shift=None):
    """3x3 pad-1 conv (+ optional fused input-side BN+ReLU) + BN statistics."""
    N, H, W, C = x.shape
    ho = (H - 1) // stride + 1
    wo = (W - 1) // stride + 1
    tn = cout_p // n_co
    if stride == 1 and _fused_conv_fits(H + 2, W + 2, C, ho, wo, tn):
        w_taps = conv3x3_weight_taps(w_torch, C, cout_p)
        return conv3x3_fused_stats(x, w_taps, bn_scale, bn_shift, n_co=n_co)
    # TODO(synk): fused variant for stride != 1 (strided pl.ds loads / parity-packed
    # layout) and for spatial extents whose per-sample slab exceeds the VMEM budget.
    if bn_scale is not None:
        x = jnp.maximum(x.astype(jnp.float32) * bn_scale.reshape(1, 1, 1, -1)
                        + bn_shift.reshape(1, 1, 1, -1), 0.0).astype(jnp.bfloat16)
    return conv3x3_im2col_stats(x, w_torch, stride, cout_p, n_co)


def conv1x1_stats(x, w_torch, stride, cout_p, n_co):
    """Shortcut 1x1 conv (stride) as a plain matmul + BN statistics."""
    xs = x[:, ::stride, ::stride, :]
    n, ho, wo, c = xs.shape
    m = n * ho * wo
    kp = _round_up(c, LANE)
    a = xs.reshape(m, c)
    if kp > c:
        a = jnp.pad(a, ((0, 0), (0, kp - c)))
    tm = _choose_tm(kp, cout_p, m)
    mp = _round_up(m, tm)
    a = jnp.pad(a, ((0, mp - m), (0, 0)))
    wmat = conv1x1_weight_matrix(w_torch, kp, cout_p)
    y, s, ss = conv_matmul_stats(a, wmat, tm=tm, tn=cout_p // n_co)
    return y[:m].reshape(n, ho, wo, cout_p), s, ss


def _pad_channels(v, cp):
    return jnp.pad(v.astype(jnp.float32), (0, cp - v.shape[0]))


def _bn_scale_shift(s, ss, m_true, gamma_p, beta_p):
    """Fold training-mode BN (biased variance, eps) into per-channel (scale, shift).

    Note: E[x^2]-E[x]^2 in f32 can cancel catastrophically when |mean| >> std; fine at
    these scales (post-conv activations), revisit (Welford) before trusting at scale.
    """
    mean = s / m_true
    var = jnp.maximum(ss / m_true - mean * mean, 0.0)
    scale = gamma_p[None, :] * lax.rsqrt(var + EPS)
    shift = beta_p[None, :] - mean * scale
    return scale, shift               # each (1, Cp) f32


# ----------------------------------------------------------------------------
# ResBlock forward (Pallas)
# ----------------------------------------------------------------------------
@functools.partial(jax.jit, static_argnums=(2,))
def resblock_forward(x_nchw, params, stride):
    # Cast to bf16 once, before any layout work (review: bf16 activation streams).
    x = jnp.transpose(x_nchw, (0, 2, 3, 1)).astype(jnp.bfloat16)     # NCHW -> NHWC
    N, H, W, Cin = x.shape
    Cout = params["w1"].shape[0]
    Ho = (H - 1) // stride + 1
    Wo = (W - 1) // stride + 1
    M = N * Ho * Wo
    Cp = _round_up(Cout, LANE)
    has_shortcut = params.get("ws") is not None
    n_co = 2 if (NUM_TENSORCORES >= 2 and Cp % (2 * LANE) == 0) else 1

    # conv1 (3x3, stride, pad=1) + fused BN1 statistics
    c1, s1, ss1 = conv3x3_stats(x, params["w1"], stride, Cp, n_co)
    sc1, sh1 = _bn_scale_shift(s1, ss1, M, _pad_channels(params["g1"], Cp),
                               _pad_channels(params["be1"], Cp))

    # conv2 (3x3, stride=1, pad=1): BN1 scale/shift + ReLU fused into the slab loads,
    # BN2 statistics fused into the conv output path.
    c2, s2, ss2 = conv3x3_stats(c1, params["w2"], 1, Cp, n_co,
                                bn_scale=sc1, bn_shift=sh1)
    sc2, sh2 = _bn_scale_shift(s2, ss2, M, _pad_channels(params["g2"], Cp),
                               _pad_channels(params["be2"], Cp))

    # shortcut branch / identity, then fused residual tail
    if has_shortcut:
        identity, s_s, ss_s = conv1x1_stats(x, params["ws"], stride, Cp, n_co)
        scs, shs = _bn_scale_shift(s_s, ss_s, M, _pad_channels(params["gs"], Cp),
                                   _pad_channels(params["bes"], Cp))
        out = bn_add_relu(c2, sc2, sh2, identity, scs, shs)
    else:
        identity = jnp.pad(x, ((0, 0), (0, 0), (0, 0), (0, Cp - Cin)))
        out = bn_add_relu(c2, sc2, sh2, identity)

    # Final slice + transpose done on bf16 data (review: no f32 NHWC->NCHW round trip).
    out = jnp.transpose(out[..., :Cout], (0, 3, 1, 2))
    return out.astype(jnp.float32)


# ----------------------------------------------------------------------------
# References (for correctness checks)
# ----------------------------------------------------------------------------
def _conv_ref_nhwc(x, w, stride, pad, dtype):
    return lax.conv_general_dilated(
        x.astype(dtype), w.astype(dtype), (stride, stride), ((pad, pad), (pad, pad)),
        dimension_numbers=("NHWC", "OIHW", "NHWC"),
        preferred_element_type=jnp.float32)


def _fold_ref(y, g, b):
    m = jnp.mean(y, axis=(0, 1, 2), keepdims=True)
    v = jnp.maximum(jnp.mean(y * y, axis=(0, 1, 2), keepdims=True) - m * m, 0.0)
    scale = g * lax.rsqrt(v + EPS)
    return scale, b - m * scale


def resblock_reference_matched(x_nchw, params, stride):
    """Reference with the kernel's bf16 quantization points (tight comparison)."""
    bf = jnp.bfloat16
    x = jnp.transpose(x_nchw, (0, 2, 3, 1)).astype(bf)
    c1 = _conv_ref_nhwc(x, params["w1"], stride, 1, bf)
    sc1, sh1 = _fold_ref(c1, params["g1"], params["be1"])
    a1 = jnp.maximum(c1.astype(bf).astype(jnp.float32) * sc1 + sh1, 0.0).astype(bf)
    c2 = _conv_ref_nhwc(a1, params["w2"], 1, 1, bf)
    sc2, sh2 = _fold_ref(c2, params["g2"], params["be2"])
    main = c2.astype(bf).astype(jnp.float32) * sc2 + sh2
    if params.get("ws") is not None:
        cs = _conv_ref_nhwc(x, params["ws"], stride, 0, bf)
        scs, shs = _fold_ref(cs, params["gs"], params["bes"])
        res = cs.astype(bf).astype(jnp.float32) * scs + shs
    else:
        res = x.astype(jnp.float32)
    out = jnp.maximum(main + res, 0.0).astype(bf)
    return jnp.transpose(out, (0, 3, 1, 2)).astype(jnp.float32)


def resblock_reference_f32(x_nchw, params, stride):
    """Full-f32 PyTorch semantics (with conv biases), loose comparison."""
    def conv(x, w, b, s, p):
        y = lax.conv_general_dilated(
            x, w, (s, s), ((p, p), (p, p)),
            dimension_numbers=("NCHW", "OIHW", "NCHW"),
            preferred_element_type=jnp.float32)
        return y + b[None, :, None, None]

    def bn(y, g, b):
        m = jnp.mean(y, axis=(0, 2, 3), keepdims=True)
        v = jnp.var(y, axis=(0, 2, 3), keepdims=True)
        return (y - m) * lax.rsqrt(v + EPS) * g[None, :, None, None] + b[None, :, None, None]

    out = jnp.maximum(bn(conv(x_nchw, params["w1"], params["b1"], stride, 1),
                         params["g1"], params["be1"]), 0.0)
    out = bn(conv(out, params["w2"], params["b2"], 1, 1), params["g2"], params["be2"])
    if params.get("ws") is not None:
        idn = bn(conv(x_nchw, params["ws"], params["bs"], stride, 0),
                 params["gs"], params["bes"])
    else:
        idn = x_nchw
    return jnp.maximum(out + idn, 0.0)


# ----------------------------------------------------------------------------
if __name__ == "__main__":
    def make_params(key, cin, cout, shortcut):
        ks = jax.random.split(key, 12)
        p = {
            "w1": 0.1 * jax.random.normal(ks[0], (cout, cin, 3, 3), jnp.float32),
            "b1": 0.1 * jax.random.normal(ks[1], (cout,), jnp.float32),
            "g1": 1.0 + 0.1 * jax.random.normal(ks[2], (cout,), jnp.float32),
            "be1": 0.1 * jax.random.normal(ks[3], (cout,), jnp.float32),
            "w2": 0.1 * jax.random.normal(ks[4], (cout, cout, 3, 3), jnp.float32),
            "b2": 0.1 * jax.random.normal(ks[5], (cout,), jnp.float32),
            "g2": 1.0 + 0.1 * jax.random.normal(ks[6], (cout,), jnp.float32),
            "be2": 0.1 * jax.random.normal(ks[7], (cout,), jnp.float32),
        }
        if shortcut:
            p["ws"] = 0.1 * jax.random.normal(ks[8], (cout, cin, 1, 1), jnp.float32)
            p["bs"] = 0.1 * jax.random.normal(ks[9], (cout,), jnp.float32)
            p["gs"] = 1.0 + 0.1 * jax.random.normal(ks[10], (cout,), jnp.float32)
            p["bes"] = 0.1 * jax.random.normal(ks[11], (cout,), jnp.float32)
        return p

    key = jax.random.PRNGKey(0)
    k_a, k_b, k_xa, k_xb = jax.random.split(key, 4)

    # Case A: stride=2, in != out  => shortcut branch + strided-conv1 fallback path.
    N, Cin, Cout, H, W, stride = 2, 4, 8, 16, 16, 2
    params_a = make_params(k_a, Cin, Cout, shortcut=True)
    x_a = jax.random.normal(k_xa, (N, Cin, H, W), jnp.float32)
    out_a = jax.block_until_ready(resblock_forward(x_a, params_a, stride))
    assert out_a.shape == (N, Cout, H // stride, W // stride), out_a.shape
    np.testing.assert_allclose(
        np.asarray(out_a), np.asarray(resblock_reference_matched(x_a, params_a, stride)),
        rtol=2e-2, atol=2e-2)
    np.testing.assert_allclose(
        np.asarray(out_a), np.asarray(resblock_reference_f32(x_a, params_a, stride)),
        rtol=1e-1, atol=1e-1)

    # Case B: stride=1, in == out  => identity shortcut + fully fused conv path.
    Cin_b = Cout_b = 8
    params_b = make_params(k_b, Cin_b, Cout_b, shortcut=False)
    x_b = jax.random.normal(k_xb, (N, Cin_b, H, W), jnp.float32)
    out_b = jax.block_until_ready(resblock_forward(x_b, params_b, 1))
    assert out_b.shape == (N, Cout_b, H, W), out_b.shape
    np.testing.assert_allclose(
        np.asarray(out_b), np.asarray(resblock_reference_matched(x_b, params_b, 1)),
        rtol=2e-2, atol=2e-2)
    np.testing.assert_allclose(
        np.asarray(out_b), np.asarray(resblock_reference_f32(x_b, params_b, 1)),
        rtol=1e-1, atol=1e-1)

    print("KERNEL_OK")
</pallas_src>

<mosaic_0001>
module attributes {stable_mosaic.version = 11 : i64} {
  func.func @_matmul_stats_kernel(%arg0: i32, %arg1: i32, %arg2: memref<128x128xbf16, #tpu.memory_space<vmem>>, %arg3: memref<128x128xbf16, #tpu.memory_space<vmem>>, %arg4: memref<128x128xbf16, #tpu.memory_space<vmem>>, %arg5: memref<1x128xf32, #tpu.memory_space<vmem>>, %arg6: memref<1x128xf32, #tpu.memory_space<vmem>>) attributes {dimension_semantics = [#tpu.dimension_semantics<parallel>, #tpu.dimension_semantics<arbitrary>], iteration_bounds = array<i64: 1, 1>, scalar_prefetch = 0 : i64, scratch_operands = 0 : i64, tpu.core_type = #tpu.core_type<tc>, window_params = [{transform_indices = @transform_0, window_bounds = array<i64: 128, 128>}, {transform_indices = @transform_1, window_bounds = array<i64: 128, 128>}, {transform_indices = @transform_2, window_bounds = array<i64: 128, 128>}, {transform_indices = @transform_3, window_bounds = array<i64: 1, 128>}, {transform_indices = @transform_4, window_bounds = array<i64: 1, 128>}]} {
    %c0_i32 = arith.constant 0 : i32
    %0 = arith.cmpi eq, %arg1, %c0_i32 : i32
    %1 = arith.extui %0 : i1 to i32
    %c0_i32_0 = arith.constant 0 : i32
    %2 = arith.cmpi ne, %1, %c0_i32_0 : i32
    scf.if %2 {
      %cst_16 = arith.constant 0.000000e+00 : f32
      %19 = vector.broadcast %cst_16 : f32 to vector<1x128xf32>
      %c0_17 = arith.constant 0 : index
      %c0_18 = arith.constant 0 : index
      %20 = vector.load %arg5[%c0_17, %c0_18] : memref<1x128xf32, #tpu.memory_space<vmem>>, vector<1x128xf32>
      tpu.vector_store %arg5[%c0_17, %c0_18], %19 {strides = array<i32>} : memref<1x128xf32, #tpu.memory_space<vmem>>, vector<1x128xf32>,
      %cst_19 = arith.constant 0.000000e+00 : f32
      %21 = vector.broadcast %cst_19 : f32 to vector<1x128xf32>
      %c0_20 = arith.constant 0 : index
      %c0_21 = arith.constant 0 : index
      %22 = vector.load %arg6[%c0_20, %c0_21] : memref<1x128xf32, #tpu.memory_space<vmem>>, vector<1x128xf32>
      tpu.vector_store %arg6[%c0_20, %c0_21], %21 {strides = array<i32>} : memref<1x128xf32, #tpu.memory_space<vmem>>, vector<1x128xf32>,
    } else {
    }
    %c0 = arith.constant 0 : index
    %c0_1 = arith.constant 0 : index
    %3 = vector.load %arg2[%c0, %c0_1] : memref<128x128xbf16, #tpu.memory_space<vmem>>, vector<128x128xbf16>
    %c0_2 = arith.constant 0 : index
    %c0_3 = arith.constant 0 : index
    %4 = vector.load %arg3[%c0_2, %c0_3] : memref<128x128xbf16, #tpu.memory_space<vmem>>, vector<128x128xbf16>
    %cst = arith.constant dense<0.000000e+00> : vector<128x128xf32>
    %5 = tpu.matmul %3, %4, %cst {dimension_numbers = #tpu.dot_dimension_numbers<[1], [0], [0], [1], [0, 0, 1, 1], [], []>} : vector<128x128xbf16>, vector<128x128xbf16>, vector<128x128xf32> -> vector<128x128xf32>
    %6 = arith.truncf %5 : vector<128x128xf32> to vector<128x128xbf16>
    %c0_4 = arith.constant 0 : index
    %c0_5 = arith.constant 0 : index
    %7 = vector.load %arg4[%c0_4, %c0_5] : memref<128x128xbf16, #tpu.memory_space<vmem>>, vector<128x128xbf16>
    tpu.vector_store %arg4[%c0_4, %c0_5], %6 {strides = array<i32>} : memref<128x128xbf16, #tpu.memory_space<vmem>>, vector<128x128xbf16>,
    %c0_6 = arith.constant 0 : index
    %c0_7 = arith.constant 0 : index
    %8 = vector.load %arg5[%c0_6, %c0_7] : memref<1x128xf32, #tpu.memory_space<vmem>>, vector<1x128xf32>
    %cst_8 = arith.constant dense<0.000000e+00> : vector<128xf32>
    %9 = vector.multi_reduction <add>, %5, %cst_8 [0] : vector<128x128xf32> to vector<128xf32>
    %10 = vector.shape_cast %9 : vector<128xf32> to vector<1x128xf32>
    %11 = arith.addf %8, %10 : vector<1x128xf32>
    %c0_9 = arith.constant 0 : index
    %c0_10 = arith.constant 0 : index
    %12 = vector.load %arg5[%c0_9, %c0_10] : memref<1x128xf32, #tpu.memory_space<vmem>>, vector<1x128xf32>
    tpu.vector_store %arg5[%c0_9, %c0_10], %11 {strides = array<i32>} : memref<1x128xf32, #tpu.memory_space<vmem>>, vector<1x128xf32>,
    %c0_11 = arith.constant 0 : index
    %c0_12 = arith.constant 0 : index
    %13 = vector.load %arg6[%c0_11, %c0_12] : memref<1x128xf32, #tpu.memory_space<vmem>>, vector<1x128xf32>
    %14 = arith.mulf %5, %5 : vector<128x128xf32>
    %cst_13 = arith.constant dense<0.000000e+00> : vector<128xf32>
    %15 = vector.multi_reduction <add>, %14, %cst_13 [0] : vector<128x128xf32> to vector<128xf32>
    %16 = vector.shape_cast %15 : vector<128xf32> to vector<1x128xf32>
    %17 = arith.addf %13, %16 : vector<1x128xf32>
    %c0_14 = arith.constant 0 : index
    %c0_15 = arith.constant 0 : index
    %18 = vector.load %arg6[%c0_14, %c0_15] : memref<1x128xf32, #tpu.memory_space<vmem>>, vector<1x128xf32>
    tpu.vector_store %arg6[%c0_14, %c0_15], %17 {strides = array<i32>} : memref<1x128xf32, #tpu.memory_space<vmem>>, vector<1x128xf32>,
    return
  }
  func.func @transform_0(%arg0: i32, %arg1: i32) -> (i32, i32) {
    %c0_i32 = arith.constant 0 : i32
    %c0_i32_0 = arith.constant 0 : i32
    return %arg1, %c0_i32 : i32, i32
  }
  func.func @transform_1(%arg0: i32, %arg1: i32) -> (i32, i32) {
    %c0_i32 = arith.constant 0 : i32
    %c0_i32_0 = arith.constant 0 : i32
    return %c0_i32, %arg0 : i32, i32
  }
  func.func @transform_2(%arg0: i32, %arg1: i32) -> (i32, i32) {
    %c0_i32 = arith.constant 0 : i32
    return %arg1, %arg0 : i32, i32
  }
  func.func @transform_3(%arg0: i32, %arg1: i32) -> (i32, i32) {
    %c0_i32 = arith.constant 0 : i32
    %c0_i32_0 = arith.constant 0 : i32
    return %c0_i32, %arg0 : i32, i32
  }
  func.func @transform_4(%arg0: i32, %arg1: i32) -> (i32, i32) {
    %c0_i32 = arith.constant 0 : i32
    %c0_i32_0 = arith.constant 0 : i32
    return %c0_i32, %arg0 : i32, i32
  }
}

module attributes {stable_mosaic.version = 11 : i64} {
  func.func @_conv3x3_kernel(%arg0: i32, %arg1: i32, %arg2: memref<1x10x10x128xbf16, #tpu.memory_space<vmem>>, %arg3: memref<9x128x128xbf16, #tpu.memory_space<vmem>>, %arg4: memref<1x128xf32, #tpu.memory_space<vmem>>, %arg5: memref<1x128xf32, #tpu.memory_space<vmem>>, %arg6: memref<1x8x8x128xbf16, #tpu.memory_space<vmem>>, %arg7: memref<1x128xf32, #tpu.memory_space<vmem>>, %arg8: memref<1x128xf32, #tpu.memory_space<vmem>>) attributes {dimension_semantics = [#tpu.dimension_semantics<parallel>, #tpu.dimension_semantics<arbitrary>], iteration_bounds = array<i64: 1, 2>, scalar_prefetch = 0 : i64, scratch_operands = 0 : i64, tpu.core_type = #tpu.core_type<tc>, window_params = [{transform_indices = @transform_0, window_bounds = array<i64: 1, 10, 10, 128>}, {transform_indices = @transform_1, window_bounds = array<i64: 9, 128, 128>}, {pipeline_mode = #tpu.pipeline_mode<synchronous>, transform_indices = @transform_2, window_bounds = array<i64: 1, 128>}, {pipeline_mode = #tpu.pipeline_mode<synchronous>, transform_indices = @transform_3, window_bounds = array<i64: 1, 128>}, {transform_indices = @transform_4, window_bounds = array<i64: 1, 8, 8, 128>}, {transform_indices = @transform_5, window_bounds = array<i64: 1, 128>}, {transform_indices = @transform_6, window_bounds = array<i64: 1, 128>}]} {
    %c0_i32 = arith.constant 0 : i32
    %0 = arith.cmpi eq, %arg1, %c0_i32 : i32
    %1 = arith.extui %0 : i1 to i32
    %c0_i32_0 = arith.constant 0 : i32
    %2 = arith.cmpi ne, %1, %c0_i32_0 : i32
    scf.if %2 {
      %cst = arith.constant 0.000000e+00 : f32
      %34 = vector.broadcast %cst : f32 to vector<1x128xf32>
      %c0_17 = arith.constant 0 : index
      %c0_18 = arith.constant 0 : index
      %35 = vector.load %arg7[%c0_17, %c0_18] : memref<1x128xf32, #tpu.memory_space<vmem>>, vector<1x128xf32>
      tpu.vector_store %arg7[%c0_17, %c0_18], %34 {strides = array<i32>} : memref<1x128xf32, #tpu.memory_space<vmem>>, vector<1x128xf32>,
      %cst_19 = arith.constant 0.000000e+00 : f32
      %36 = vector.broadcast %cst_19 : f32 to vector<1x128xf32>
      %c0_20 = arith.constant 0 : index
      %c0_21 = arith.constant 0 : index
      %37 = vector.load %arg8[%c0_20, %c0_21] : memref<1x128xf32, #tpu.memory_space<vmem>>, vector<1x128xf32>
      tpu.vector_store %arg8[%c0_20, %c0_21], %36 {strides = array<i32>} : memref<1x128xf32, #tpu.memory_space<vmem>>, vector<1x128xf32>,
    } else {
    }
    %c0 = arith.constant 0 : index
    %c0_1 = arith.constant 0 : index
    %3 = vector.load %arg4[%c0, %c0_1] : memref<1x128xf32, #tpu.memory_space<vmem>>, vector<1x128xf32>
    %c0_2 = arith.constant 0 : index
    %c0_3 = arith.constant 0 : index
    %4 = vector.load %arg5[%c0_2, %c0_3] : memref<1x128xf32, #tpu.memory_space<vmem>>, vector<1x128xf32>
    %5 = tpu.iota {dimensions = array<i32: 0>} : vector<8x1xi32>
    %c0_i32_4 = arith.constant 0 : i32
    %6 = vector.broadcast %c0_i32_4 : i32 to vector<8x1xi32>
    %7 = arith.addi %5, %6 : vector<8x1xi32>
    %c1_i32 = arith.constant 1 : i32
    %8 = vector.broadcast %c1_i32 : i32 to vector<8x1xi32>
    %9 = arith.cmpi sge, %7, %8 : vector<8x1xi32>
    %c0_i32_5 = arith.constant 0 : i32
    %10 = vector.broadcast %c0_i32_5 : i32 to vector<8x1xi32>
    %11 = arith.addi %5, %10 : vector<8x1xi32>
    %c8_i32 = arith.constant 8 : i32
    %12 = vector.broadcast %c8_i32 : i32 to vector<8x1xi32>
    %13 = arith.cmpi sle, %11, %12 : vector<8x1xi32>
    %14 = arith.andi %9, %13 : vector<8x1xi1>
    %c1_i32_6 = arith.constant 1 : i32
    %15 = vector.broadcast %c1_i32_6 : i32 to vector<8x1xi32>
    %16 = arith.addi %5, %15 : vector<8x1xi32>
    %c1_i32_7 = arith.constant 1 : i32
    %17 = vector.broadcast %c1_i32_7 : i32 to vector<8x1xi32>
    %18 = arith.cmpi sge, %16, %17 : vector<8x1xi32>
    %c1_i32_8 = arith.constant 1 : i32
    %19 = vector.broadcast %c1_i32_8 : i32 to vector<8x1xi32>
    %20 = arith.addi %5, %19 : vector<8x1xi32>
    %c8_i32_9 = arith.constant 8 : i32
    %21 = vector.broadcast %c8_i32_9 : i32 to vector<8x1xi32>
    %22 = arith.cmpi sle, %20, %21 : vector<8x1xi32>
    %23 = arith.andi %18, %22 : vector<8x1xi1>
    %c2_i32 = arith.constant 2 : i32
    %24 = vector.broadcast %c2_i32 : i32 to vector<8x1xi32>
    %25 = arith.addi %5, %24 : vector<8x1xi32>
    %c1_i32_10 = arith.constant 1 : i32
    %26 = vector.broadcast %c1_i32_10 : i32 to vector<8x1xi32>
    %27 = arith.cmpi sge, %25, %26 : vector<8x1xi32>
    %c2_i32_11 = arith.constant 2 : i32
    %28 = vector.broadcast %c2_i32_11 : i32 to vector<8x1xi32>
    %29 = arith.addi %5, %28 : vector<8x1xi32>
    %c8_i32_12 = arith.constant 8 : i32
    %30 = vector.broadcast %c8_i32_12 : i32 to vector<8x1xi32>
    %31 = arith.cmpi sle, %29, %30 : vector<8x1xi32>
    %32 = arith.andi %27, %31 : vector<8x1xi1>
    %c0_i32_13 = arith.constant 0 : i32
    %c8_i32_14 = arith.constant 8 : i32
    %33 = arith.addi %c0_i32_13, %c8_i32_14 : i32
    %c1_i32_15 = arith.constant 1 : i32
    scf.for %arg9 = %c0_i32_13 to %33 step %c1_i32_15  : i32 {
      %cst = arith.constant 0.000000e+00 : f32
      %34 = vector.broadcast %cst : f32 to vector<8x128xf32>
      %c0_i32_17 = arith.constant 0 : i32
      %35 = arith.addi %arg9, %c0_i32_17 : i32
      %c0_18 = arith.constant 0 : index
      %36 = arith.index_cast %35 : i32 to index
      %c0_19 = arith.constant 0 : index
      %c0_20 = arith.constant 0 : index
      %37 = vector.load %arg2[%c0_18, %36, %c0_19, %c0_20] : memref<1x10x10x128xbf16, #tpu.memory_space<vmem>>, vector<1x1x8x128xbf16>
      %38 = vector.shape_cast %37 : vector<1x1x8x128xbf16> to vector<8x128xbf16>
      %c1_i32_21 = arith.constant 1 : i32
      %39 = arith.cmpi sge, %35, %c1_i32_21 : i32
      %c8_i32_22 = arith.constant 8 : i32
      %40 = arith.cmpi sle, %35, %c8_i32_22 : i32
      %41 = arith.andi %39, %40 : i1
      %42 = arith.extf %38 : vector<8x128xbf16> to vector<8x128xf32>
      %43 = vector.broadcast %3 : vector<1x128xf32> to vector<8x128xf32>
      %44 = arith.mulf %42, %43 : vector<8x128xf32>
      %45 = vector.broadcast %4 : vector<1x128xf32> to vector<8x128xf32>
      %46 = arith.addf %44, %45 : vector<8x128xf32>
      %cst_23 = arith.constant 0.000000e+00 : f32
      %47 = vector.broadcast %cst_23 : f32 to vector<8x128xf32>
      %48 = arith.maximumf %46, %47 : vector<8x128xf32>
      %49 = vector.broadcast %41 : i1 to vector<8x1xi1>
      %50 = arith.andi %14, %49 : vector<8x1xi1>
      %cst_24 = arith.constant 0.000000e+00 : f32
      %51 = vector.shape_cast %50 : vector<8x1xi1> to vector<8x1xi1>
      %52 = vector.broadcast %51 : vector<8x1xi1> to vector<8x128xi1>
      %53 = vector.broadcast %cst_24 : f32 to vector<8x128xf32>
      %54 = arith.select %52, %48, %53 : vector<8x128xi1>, vector<8x128xf32>
      %55 = arith.truncf %54 : vector<8x128xf32> to vector<8x128xbf16>
      %c0_25 = arith.constant 0 : index
      %c0_26 = arith.constant 0 : index
      %c0_27 = arith.constant 0 : index
      %56 = vector.load %arg3[%c0_25, %c0_26, %c0_27] : memref<9x128x128xbf16, #tpu.memory_space<vmem>>, vector<1x128x128xbf16>
      %57 = vector.shape_cast %56 : vector<1x128x128xbf16> to vector<128x128xbf16>
      %cst_28 = arith.constant dense<0.000000e+00> : vector<8x128xf32>
      %58 = tpu.matmul %55, %57, %cst_28 {dimension_numbers = #tpu.dot_dimension_numbers<[1], [0], [0], [1], [0, 0, 1, 1], [], []>} : vector<8x128xbf16>, vector<128x128xbf16>, vector<8x128xf32> -> vector<8x128xf32>
      %59 = arith.addf %34, %58 : vector<8x128xf32>
      %c0_29 = arith.constant 0 : index
      %60 = arith.index_cast %35 : i32 to index
      %c1 = arith.constant 1 : index
      %c0_30 = arith.constant 0 : index
      %61 = vector.load %arg2[%c0_29, %60, %c1, %c0_30] : memref<1x10x10x128xbf16, #tpu.memory_space<vmem>>, vector<1x1x8x128xbf16>
      %62 = vector.shape_cast %61 : vector<1x1x8x128xbf16> to vector<8x128xbf16>
      %c1_i32_31 = arith.constant 1 : i32
      %63 = arith.cmpi sge, %35, %c1_i32_31 : i32
      %c8_i32_32 = arith.constant 8 : i32
      %64 = arith.cmpi sle, %35, %c8_i32_32 : i32
      %65 = arith.andi %63, %64 : i1
      %66 = arith.extf %62 : vector<8x128xbf16> to vector<8x128xf32>
      %67 = vector.broadcast %3 : vector<1x128xf32> to vector<8x128xf32>
      %68 = arith.mulf %66, %67 : vector<8x128xf32>
      %69 = vector.broadcast %4 : vector<1x128xf32> to vector<8x128xf32>
      %70 = arith.addf %68, %69 : vector<8x128xf32>
      %cst_33 = arith.constant 0.000000e+00 : f32
      %71 = vector.broadcast %cst_33 : f32 to vector<8x128xf32>
      %72 = arith.maximumf %70, %71 : vector<8x128xf32>
      %73 = vector.broadcast %65 : i1 to vector<8x1xi1>
      %74 = arith.andi %23, %73 : vector<8x1xi1>
      %cst_34 = arith.constant 0.000000e+00 : f32
      %75 = vector.shape_cast %74 : vector<8x1xi1> to vector<8x1xi1>
      %76 = vector.broadcast %75 : vector<8x1xi1> to vector<8x128xi1>
      %77 = vector.broadcast %cst_34 : f32 to vector<8x128xf32>
      %78 = arith.select %76, %72, %77 : vector<8x128xi1>, vector<8x128xf32>
      %79 = arith.truncf %78 : vector<8x128xf32> to vector<8x128xbf16>
      %c1_35 = arith.constant 1 : index
      %c0_36 = arith.constant 0 : index
      %c0_37 = arith.constant 0 : index
      %80 = vector.load %arg3[%c1_35, %c0_36, %c0_37] : memref<9x128x128xbf16, #tpu.memory_space<vmem>>, vector<1x128x128xbf16>
      %81 = vector.shape_cast %80 : vector<1x128x128xbf16> to vector<128x128xbf16>
      %cst_38 = arith.constant dense<0.000000e+00> : vector<8x128xf32>
      %82 = tpu.matmul %79, %81, %cst_38 {dimension_numbers = #tpu.dot_dimension_numbers<[1], [0], [0], [1], [0, 0, 1, 1], [], []>} : vector<8x128xbf16>, vector<128x128xbf16>, vector<8x128xf32> -> vector<8x128xf32>
      %83 = arith.addf %59, %82 : vector<8x128xf32>
      %c0_39 = arith.constant 0 : index
      %84 = arith.index_cast %35 : i32 to index
      %c2 = arith.constant 2 : index
      %c0_40 = arith.constant 0 : index
      %85 = vector.load %arg2[%c0_39, %84, %c2, %c0_40] : memref<1x10x10x128xbf16, #tpu.memory_space<vmem>>, vector<1x1x8x128xbf16>
      %86 = vector.shape_cast %85 : vector<1x1x8x128xbf16> to vector<8x128xbf16>
      %c1_i32_41 = arith.constant 1 : i32
      %87 = arith.cmpi sge, %35, %c1_i32_41 : i32
      %c8_i32_42 = arith.constant 8 : i32
      %88 = arith.cmpi sle, %35, %c8_i32_42 : i32
      %89 = arith.andi %87, %88 : i1
      %90 = arith.extf %86 : vector<8x128xbf16> to vector<8x128xf32>
      %91 = vector.broadcast %3 : vector<1x128xf32> to vector<8x128xf32>
      %92 = arith.mulf %90, %91 : vector<8x128xf32>
      %93 = vector.broadcast %4 : vector<1x128xf32> to vector<8x128xf32>
      %94 = arith.addf %92, %93 : vector<8x128xf32>
      %cst_43 = arith.constant 0.000000e+00 : f32
      %95 = vector.broadcast %cst_43 : f32 to vector<8x128xf32>
      %96 = arith.maximumf %94, %95 : vector<8x128xf32>
      %97 = vector.broadcast %89 : i1 to vector<8x1xi1>
      %98 = arith.andi %32, %97 : vector<8x1xi1>
      %cst_44 = arith.constant 0.000000e+00 : f32
      %99 = vector.shape_cast %98 : vector<8x1xi1> to vector<8x1xi1>
      %100 = vector.broadcast %99 : vector<8x1xi1> to vector<8x128xi1>
      %101 = vector.broadcast %cst_44 : f32 to vector<8x128xf32>
      %102 = arith.select %100, %96, %101 : vector<8x128xi1>, vector<8x128xf32>
      %103 = arith.truncf %102 : vector<8x128xf32> to vector<8x128xbf16>
      %c2_45 = arith.constant 2 : index
      %c0_46 = arith.constant 0 : index
      %c0_47 = arith.constant 0 : index
      %104 = vector.load %arg3[%c2_45, %c0_46, %c0_47] : memref<9x128x128xbf16, #tpu.memory_space<vmem>>, vector<1x128x128xbf16>
      %105 = vector.shape_cast %104 : vector<1x128x128xbf16> to vector<128x128xbf16>
      %cst_48 = arith.constant dense<0.000000e+00> : vector<8x128xf32>
      %106 = tpu.matmul %103, %105, %cst_48 {dimension_numbers = #tpu.dot_dimension_numbers<[1], [0], [0], [1], [0, 0, 1, 1], [], []>} : vector<8x128xbf16>, vector<128x128xbf16>, vector<8x128xf32> -> vector<8x128xf32>
      %107 = arith.addf %83, %106 : vector<8x128xf32>
      %c1_i32_49 = arith.constant 1 : i32
      %108 = arith.addi %arg9, %c1_i32_49 : i32
      %c0_50 = arith.constant 0 : index
      %109 = arith.index_cast %108 : i32 to index
      %c0_51 = arith.constant 0 : index
      %c0_52 = arith.constant 0 : index
      %110 = vector.load %arg2[%c0_50, %109, %c0_51, %c0_52] : memref<1x10x10x128xbf16, #tpu.memory_space<vmem>>, vector<1x1x8x128xbf16>
      %111 = vector.shape_cast %110 : vector<1x1x8x128xbf16> to vector<8x128xbf16>
      %c1_i32_53 = arith.constant 1 : i32
      %112 = arith.cmpi sge, %108, %c1_i32_53 : i32
      %c8_i32_54 = arith.constant 8 : i32
      %113 = arith.cmpi sle, %108, %c8_i32_54 : i32
      %114 = arith.andi %112, %113 : i1
      %115 = arith.extf %111 : vector<8x128xbf16> to vector<8x128xf32>
      %116 = vector.broadcast %3 : vector<1x128xf32> to vector<8x128xf32>
      %117 = arith.mulf %115, %116 : vector<8x128xf32>
      %118 = vector.broadcast %4 : vector<1x128xf32> to vector<8x128xf32>
      %119 = arith.addf %117, %118 : vector<8x128xf32>
      %cst_55 = arith.constant 0.000000e+00 : f32
      %120 = vector.broadcast %cst_55 : f32 to vector<8x128xf32>
      %121 = arith.maximumf %119, %120 : vector<8x128xf32>
      %122 = vector.broadcast %114 : i1 to vector<8x1xi1>
      %123 = arith.andi %14, %122 : vector<8x1xi1>
      %cst_56 = arith.constant 0.000000e+00 : f32
      %124 = vector.shape_cast %123 : vector<8x1xi1> to vector<8x1xi1>
      %125 = vector.broadcast %124 : vector<8x1xi1> to vector<8x128xi1>
      %126 = vector.broadcast %cst_56 : f32 to vector<8x128xf32>
      %127 = arith.select %125, %121, %126 : vector<8x128xi1>, vector<8x128xf32>
      %128 = arith.truncf %127 : vector<8x128xf32> to vector<8x128xbf16>
      %c3 = arith.constant 3 : index
      %c0_57 = arith.constant 0 : index
      %c0_58 = arith.constant 0 : index
      %129 = vector.load %arg3[%c3, %c0_57, %c0_58] : memref<9x128x128xbf16, #tpu.memory_space<vmem>>, vector<1x128x128xbf16>
      %130 = vector.shape_cast %129 : vector<1x128x128xbf16> to vector<128x128xbf16>
      %cst_59 = arith.constant dense<0.000000e+00> : vector<8x128xf32>
      %131 = tpu.matmul %128, %130, %cst_59 {dimension_numbers = #tpu.dot_dimension_numbers<[1], [0], [0], [1], [0, 0, 1, 1], [], []>} : vector<8x128xbf16>, vector<128x128xbf16>, vector<8x128xf32> -> vector<8x128xf32>
      %132 = arith.addf %107, %131 : vector<8x128xf32>
      %c0_60 = arith.constant 0 : index
      %133 = arith.index_cast %108 : i32 to index
      %c1_61 = arith.constant 1 : index
      %c0_62 = arith.constant 0 : index
      %134 = vector.load %arg2[%c0_60, %133, %c1_61, %c0_62] : memref<1x10x10x128xbf16, #tpu.memory_space<vmem>>, vector<1x1x8x128xbf16>
      %135 = vector.shape_cast %134 : vector<1x1x8x128xbf16> to vector<8x128xbf16>
      %c1_i32_63 = arith.constant 1 : i32
      %136 = arith.cmpi sge, %108, %c1_i32_63 : i32
      %c8_i32_64 = arith.constant 8 : i32
      %137 = arith.cmpi sle, %108, %c8_i32_64 : i32
      %138 = arith.andi %136, %137 : i1
      %139 = arith.extf %135 : vector<8x128xbf16> to vector<8x128xf32>
      %140 = vector.broadcast %3 : vector<1x128xf32> to vector<8x128xf32>
      %141 = arith.mulf %139, %140 : vector<8x128xf32>
      %142 = vector.broadcast %4 : vector<1x128xf32> to vector<8x128xf32>
      %143 = arith.addf %141, %142 : vector<8x128xf32>
      %cst_65 = arith.constant 0.000000e+00 : f32
      %144 = vector.broadcast %cst_65 : f32 to vector<8x128xf32>
      %145 = arith.maximumf %143, %144 : vector<8x128xf32>
      %146 = vector.broadcast %138 : i1 to vector<8x1xi1>
      %147 = arith.andi %23, %146 : vector<8x1xi1>
      %cst_66 = arith.constant 0.000000e+00 : f32
      %148 = vector.shape_cast %147 : vector<8x1xi1> to vector<8x1xi1>
      %149 = vector.broadcast %148 : vector<8x1xi1> to vector<8x128xi1>
      %150 = vector.broadcast %cst_66 : f32 to vector<8x128xf32>
      %151 = arith.select %149, %145, %150 : vector<8x128xi1>, vector<8x128xf32>
      %152 = arith.truncf %151 : vector<8x128xf32> to vector<8x128xbf16>
      %c4 = arith.constant 4 : index
      %c0_67 = arith.constant 0 : index
      %c0_68 = arith.constant 0 : index
      %153 = vector.load %arg3[%c4, %c0_67, %c0_68] : memref<9x128x128xbf16, #tpu.memory_space<vmem>>, vector<1x128x128xbf16>
      %154 = vector.shape_cast %153 : vector<1x128x128xbf16> to vector<128x128xbf16>
      %cst_69 = arith.constant dense<0.000000e+00> : vector<8x128xf32>
      %155 = tpu.matmul %152, %154, %cst_69 {dimension_numbers = #tpu.dot_dimension_numbers<[1], [0], [0], [1], [0, 0, 1, 1], [], []>} : vector<8x128xbf16>, vector<128x128xbf16>, vector<8x128xf32> -> vector<8x128xf32>
      %156 = arith.addf %132, %155 : vector<8x128xf32>
      %c0_70 = arith.constant 0 : index
      %157 = arith.index_cast %108 : i32 to index
      %c2_71 = arith.constant 2 : index
      %c0_72 = arith.constant 0 : index
      %158 = vector.load %arg2[%c0_70, %157, %c2_71, %c0_72] : memref<1x10x10x128xbf16, #tpu.memory_space<vmem>>, vector<1x1x8x128xbf16>
      %159 = vector.shape_cast %158 : vector<1x1x8x128xbf16> to vector<8x128xbf16>
      %c1_i32_73 = arith.constant 1 : i32
      %160 = arith.cmpi sge, %108, %c1_i32_73 : i32
      %c8_i32_74 = arith.constant 8 : i32
      %161 = arith.cmpi sle, %108, %c8_i32_74 : i32
      %162 = arith.andi %160, %161 : i1
      %163 = arith.extf %159 : vector<8x128xbf16> to vector<8x128xf32>
      %164 = vector.broadcast %3 : vector<1x128xf32> to vector<8x128xf32>
      %165 = arith.mulf %163, %164 : vector<8x128xf32>
      %166 = vector.broadcast %4 : vector<1x128xf32> to vector<8x128xf32>
      %167 = arith.addf %165, %166 : vector<8x128xf32>
      %cst_75 = arith.constant 0.000000e+00 : f32
      %168 = vector.broadcast %cst_75 : f32 to vector<8x128xf32>
      %169 = arith.maximumf %167, %168 : vector<8x128xf32>
      %170 = vector.broadcast %162 : i1 to vector<8x1xi1>
      %171 = arith.andi %32, %170 : vector<8x1xi1>
      %cst_76 = arith.constant 0.000000e+00 : f32
      %172 = vector.shape_cast %171 : vector<8x1xi1> to vector<8x1xi1>
      %173 = vector.broadcast %172 : vector<8x1xi1> to vector<8x128xi1>
      %174 = vector.broadcast %cst_76 : f32 to vector<8x128xf32>
      %175 = arith.select %173, %169, %174 : vector<8x128xi1>, vector<8x128xf32>
      %176 = arith.truncf %175 : vector<8x128xf32> to vector<8x128xbf16>
      %c5 = arith.constant 5 : index
      %c0_77 = arith.constant 0 : index
      %c0_78 = arith.constant 0 : index
      %177 = vector.load %arg3[%c5, %c0_77, %c0_78] : memref<9x128x128xbf16, #tpu.memory_space<vmem>>, vector<1x128x128xbf16>
      %178 = vector.shape_cast %177 : vector<1x128x128xbf16> to vector<128x128xbf16>
      %cst_79 = arith.constant dense<0.000000e+00> : vector<8x128xf32>
      %179 = tpu.matmul %176, %178, %cst_79 {dimension_numbers = #tpu.dot_dimension_numbers<[1], [0], [0], [1], [0, 0, 1, 1], [], []>} : vector<8x128xbf16>, vector<128x128xbf16>, vector<8x128xf32> -> vector<8x128xf32>
      %180 = arith.addf %156, %179 : vector<8x128xf32>
      %c2_i32_80 = arith.constant 2 : i32
      %181 = arith.addi %arg9, %c2_i32_80 : i32
      %c0_81 = arith.constant 0 : index
      %182 = arith.index_cast %181 : i32 to index
      %c0_82 = arith.constant 0 : index
      %c0_83 = arith.constant 0 : index
      %183 = vector.load %arg2[%c0_81, %182, %c0_82, %c0_83] : memref<1x10x10x128xbf16, #tpu.memory_space<vmem>>, vector<1x1x8x128xbf16>
      %184 = vector.shape_cast %183 : vector<1x1x8x128xbf16> to vector<8x128xbf16>
      %c1_i32_84 = arith.constant 1 : i32
      %185 = arith.cmpi sge, %181, %c1_i32_84 : i32
      %c8_i32_85 = arith.constant 8 : i32
      %186 = arith.cmpi sle, %181, %c8_i32_85 : i32
      %187 = arith.andi %185, %186 : i1
      %188 = arith.extf %184 : vector<8x128xbf16> to vector<8x128xf32>
      %189 = vector.broadcast %3 : vector<1x128xf32> to vector<8x128xf32>
      %190 = arith.mulf %188, %189 : vector<8x128xf32>
      %191 = vector.broadcast %4 : vector<1x128xf32> to vector<8x128xf32>
      %192 = arith.addf %190, %191 : vector<8x128xf32>
      %cst_86 = arith.constant 0.000000e+00 : f32
      %193 = vector.broadcast %cst_86 : f32 to vector<8x128xf32>
      %194 = arith.maximumf %192, %193 : vector<8x128xf32>
      %195 = vector.broadcast %187 : i1 to vector<8x1xi1>
      %196 = arith.andi %14, %195 : vector<8x1xi1>
      %cst_87 = arith.constant 0.000000e+00 : f32
      %197 = vector.shape_cast %196 : vector<8x1xi1> to vector<8x1xi1>
      %198 = vector.broadcast %197 : vector<8x1xi1> to vector<8x128xi1>
      %199 = vector.broadcast %cst_87 : f32 to vector<8x128xf32>
      %200 = arith.select %198, %194, %199 : vector<8x128xi1>, vector<8x128xf32>
      %201 = arith.truncf %200 : vector<8x128xf32> to vector<8x128xbf16>
      %c6 = arith.constant 6 : index
      %c0_88 = arith.constant 0 : index
      %c0_89 = arith.constant 0 : index
      %202 = vector.load %arg3[%c6, %c0_88, %c0_89] : memref<9x128x128xbf16, #tpu.memory_space<vmem>>, vector<1x128x128xbf16>
      %203 = vector.shape_cast %202 : vector<1x128x128xbf16> to vector<128x128xbf16>
      %cst_90 = arith.constant dense<0.000000e+00> : vector<8x128xf32>
      %204 = tpu.matmul %201, %203, %cst_90 {dimension_numbers = #tpu.dot_dimension_numbers<[1], [0], [0], [1], [0, 0, 1, 1], [], []>} : vector<8x128xbf16>, vector<128x128xbf16>, vector<8x128xf32> -> vector<8x128xf32>
      %205 = arith.addf %180, %204 : vector<8x128xf32>
      %c0_91 = arith.constant 0 : index
      %206 = arith.index_cast %181 : i32 to index
      %c1_92 = arith.constant 1 : index
      %c0_93 = arith.constant 0 : index
      %207 = vector.load %arg2[%c0_91, %206, %c1_92, %c0_93] : memref<1x10x10x128xbf16, #tpu.memory_space<vmem>>, vector<1x1x8x128xbf16>
      %208 = vector.shape_cast %207 : vector<1x1x8x128xbf16> to vector<8x128xbf16>
      %c1_i32_94 = arith.constant 1 : i32
      %209 = arith.cmpi sge, %181, %c1_i32_94 : i32
      %c8_i32_95 = arith.constant 8 : i32
      %210 = arith.cmpi sle, %181, %c8_i32_95 : i32
      %211 = arith.andi %209, %210 : i1
      %212 = arith.extf %208 : vector<8x128xbf16> to vector<8x128xf32>
      %213 = vector.broadcast %3 : vector<1x128xf32> to vector<8x128xf32>
      %214 = arith.mulf %212, %213 : vector<8x128xf32>
      %215 = vector.broadcast %4 : vector<1x128xf32> to vector<8x128xf32>
      %216 = arith.addf %214, %215 : vector<8x128xf32>
      %cst_96 = arith.constant 0.000000e+00 : f32
      %217 = vector.broadcast %cst_96 : f32 to vector<8x128xf32>
      %218 = arith.maximumf %216, %217 : vector<8x128xf32>
      %219 = vector.broadcast %211 : i1 to vector<8x1xi1>
      %220 = arith.andi %23, %219 : vector<8x1xi1>
      %cst_97 = arith.constant 0.000000e+00 : f32
      %221 = vector.shape_cast %220 : vector<8x1xi1> to vector<8x1xi1>
      %222 = vector.broadcast %221 : vector<8x1xi1> to vector<8x128xi1>
      %223 = vector.broadcast %cst_97 : f32 to vector<8x128xf32>
      %224 = arith.select %222, %218, %223 : vector<8x128xi1>, vector<8x128xf32>
      %225 = arith.truncf %224 : vector<8x128xf32> to vector<8x128xbf16>
      %c7 = arith.constant 7 : index
      %c0_98 = arith.constant 0 : index
      %c0_99 = arith.constant 0 : index
      %226 = vector.load %arg3[%c7, %c0_98, %c0_99] : memref<9x128x128xbf16, #tpu.memory_space<vmem>>, vector<1x128x128xbf16>
      %227 = vector.shape_cast %226 : vector<1x128x128xbf16> to vector<128x128xbf16>
      %cst_100 = arith.constant dense<0.000000e+00> : vector<8x128xf32>
      %228 = tpu.matmul %225, %227, %cst_100 {dimension_numbers = #tpu.dot_dimension_numbers<[1], [0], [0], [1], [0, 0, 1, 1], [], []>} : vector<8x128xbf16>, vector<128x128xbf16>, vector<8x128xf32> -> vector<8x128xf32>
      %229 = arith.addf %205, %228 : vector<8x128xf32>
      %c0_101 = arith.constant 0 : index
      %230 = arith.index_cast %181 : i32 to index
      %c2_102 = arith.constant 2 : index
      %c0_103 = arith.constant 0 : index
      %231 = vector.load %arg2[%c0_101, %230, %c2_102, %c0_103] : memref<1x10x10x128xbf16, #tpu.memory_space<vmem>>, vector<1x1x8x128xbf16>
      %232 = vector.shape_cast %231 : vector<1x1x8x128xbf16> to vector<8x128xbf16>
      %c1_i32_104 = arith.constant 1 : i32
      %233 = arith.cmpi sge, %181, %c1_i32_104 : i32
      %c8_i32_105 = arith.constant 8 : i32
      %234 = arith.cmpi sle, %181, %c8_i32_105 : i32
      %235 = arith.andi %233, %234 : i1
      %236 = arith.extf %232 : vector<8x128xbf16> to vector<8x128xf32>
      %237 = vector.broadcast %3 : vector<1x128xf32> to vector<8x128xf32>
      %238 = arith.mulf %236, %237 : vector<8x128xf32>
      %239 = vector.broadcast %4 : vector<1x128xf32> to vector<8x128xf32>
      %240 = arith.addf %238, %239 : vector<8x128xf32>
      %cst_106 = arith.constant 0.000000e+00 : f32
      %241 = vector.broadcast %cst_106 : f32 to vector<8x128xf32>
      %242 = arith.maximumf %240, %241 : vector<8x128xf32>
      %243 = vector.broadcast %235 : i1 to vector<8x1xi1>
      %244 = arith.andi %32, %243 : vector<8x1xi1>
      %cst_107 = arith.constant 0.000000e+00 : f32
      %245 = vector.shape_cast %244 : vector<8x1xi1> to vector<8x1xi1>
      %246 = vector.broadcast %245 : vector<8x1xi1> to vector<8x128xi1>
      %247 = vector.broadcast %cst_107 : f32 to vector<8x128xf32>
      %248 = arith.select %246, %242, %247 : vector<8x128xi1>, vector<8x128xf32>
      %249 = arith.truncf %248 : vector<8x128xf32> to vector<8x128xbf16>
      %c8 = arith.constant 8 : index
      %c0_108 = arith.constant 0 : index
      %c0_109 = arith.constant 0 : index
      %250 = vector.load %arg3[%c8, %c0_108, %c0_109] : memref<9x128x128xbf16, #tpu.memory_space<vmem>>, vector<1x128x128xbf16>
      %251 = vector.shape_cast %250 : vector<1x128x128xbf16> to vector<128x128xbf16>
      %cst_110 = arith.constant dense<0.000000e+00> : vector<8x128xf32>
      %252 = tpu.matmul %249, %251, %cst_110 {dimension_numbers = #tpu.dot_dimension_numbers<[1], [0], [0], [1], [0, 0, 1, 1], [], []>} : vector<8x128xbf16>, vector<128x128xbf16>, vector<8x128xf32> -> vector<8x128xf32>
      %253 = arith.addf %229, %252 : vector<8x128xf32>
      %254 = arith.truncf %253 : vector<8x128xf32> to vector<8x128xbf16>
      %c0_111 = arith.constant 0 : index
      %255 = arith.index_cast %arg9 : i32 to index
      %c0_112 = arith.constant 0 : index
      %c0_113 = arith.constant 0 : index
      %256 = vector.load %arg6[%c0_111, %255, %c0_112, %c0_113] : memref<1x8x8x128xbf16, #tpu.memory_space<vmem>>, vector<1x1x8x128xbf16>
      %257 = vector.shape_cast %256 : vector<1x1x8x128xbf16> to vector<8x128xbf16>
      %258 = vector.shape_cast %254 : vector<8x128xbf16> to vector<1x1x8x128xbf16>
      tpu.vector_store %arg6[%c0_111, %255, %c0_112, %c0_113], %258 {strides = array<i32>} : memref<1x8x8x128xbf16, #tpu.memory_space<vmem>>, vector<1x1x8x128xbf16>,
      %c0_114 = arith.constant 0 : index
      %c0_115 = arith.constant 0 : index
      %259 = vector.load %arg7[%c0_114, %c0_115] : memref<1x128xf32, #tpu.memory_space<vmem>>, vector<1x128xf32>
      %cst_116 = arith.constant dense<0.000000e+00> : vector<128xf32>
      %260 = vector.multi_reduction <add>, %253, %cst_116 [0] : vector<8x128xf32> to vector<128xf32>
      %261 = vector.shape_cast %260 : vector<128xf32> to vector<1x128xf32>
      %262 = arith.addf %259, %261 : vector<1x128xf32>
      %c0_117 = arith.constant 0 : index
      %c0_118 = arith.constant 0 : index
      %263 = vector.load %arg7[%c0_117, %c0_118] : memref<1x128xf32, #tpu.memory_space<vmem>>, vector<1x128xf32>
      tpu.vector_store %arg7[%c0_117, %c0_118], %262 {strides = array<i32>} : memref<1x128xf32, #tpu.memory_space<vmem>>, vector<1x128xf32>,
      %c0_119 = arith.constant 0 : index
      %c0_120 = arith.constant 0 : index
      %264 = vector.load %arg8[%c0_119, %c0_120] : memref<1x128xf32, #tpu.memory_space<vmem>>, vector<1x128xf32>
      %265 = arith.mulf %253, %253 : vector<8x128xf32>
      %cst_121 = arith.constant dense<0.000000e+00> : vector<128xf32>
      %266 = vector.multi_reduction <add>, %265, %cst_121 [0] : vector<8x128xf32> to vector<128xf32>
      %267 = vector.shape_cast %266 : vector<128xf32> to vector<1x128xf32>
      %268 = arith.addf %264, %267 : vector<1x128xf32>
      %c0_122 = arith.constant 0 : index
      %c0_123 = arith.constant 0 : index
      %269 = vector.load %arg8[%c0_122, %c0_123] : memref<1x128xf32, #tpu.memory_space<vmem>>, vector<1x128xf32>
      tpu.vector_store %arg8[%c0_122, %c0_123], %268 {strides = array<i32>} : memref<1x128xf32, #tpu.memory_space<vmem>>, vector<1x128xf32>,
    }
    %c8_i32_16 = arith.constant 8 : i32
    return
  }
  func.func @transform_0(%arg0: i32, %arg1: i32) -> (i32, i32, i32, i32) {
    %c0_i32 = arith.constant 0 : i32
    %c0_i32_0 = arith.constant 0 : i32
    %c0_i32_1 = arith.constant 0 : i32
    %c0_i32_2 = arith.constant 0 : i32
    return %arg1, %c0_i32, %c0_i32_0, %c0_i32_1 : i32, i32, i32, i32
  }
  func.func @transform_1(%arg0: i32, %arg1: i32) -> (i32, i32, i32) {
    %c0_i32 = arith.constant 0 : i32
    %c0_i32_0 = arith.constant 0 : i32
    %c0_i32_1 = arith.constant 0 : i32
    return %c0_i32, %c0_i32_0, %arg0 : i32, i32, i32
  }
  func.func @transform_2(%arg0: i32, %arg1: i32) -> (i32, i32) {
    %c0_i32 = arith.constant 0 : i32
    %c0_i32_0 = arith.constant 0 : i32
    %c0_i32_1 = arith.constant 0 : i32
    return %c0_i32, %c0_i32_0 : i32, i32
  }
  func.func @transform_3(%arg0: i32, %arg1: i32) -> (i32, i32) {
    %c0_i32 = arith.constant 0 : i32
    %c0_i32_0 = arith.constant 0 : i32
    %c0_i32_1 = arith.constant 0 : i32
    return %c0_i32, %c0_i32_0 : i32, i32
  }
  func.func @transform_4(%arg0: i32, %arg1: i32) -> (i32, i32, i32, i32) {
    %c0_i32 = arith.constant 0 : i32
    %c0_i32_0 = arith.constant 0 : i32
    %c0_i32_1 = arith.constant 0 : i32
    return %arg1, %c0_i32, %c0_i32_0, %arg0 : i32, i32, i32, i32
  }
  func.func @transform_5(%arg0: i32, %arg1: i32) -> (i32, i32) {
    %c0_i32 = arith.constant 0 : i32
    %c0_i32_0 = arith.constant 0 : i32
    return %c0_i32, %arg0 : i32, i32
  }
  func.func @transform_6(%arg0: i32, %arg1: i32) -> (i32, i32) {
    %c0_i32 = arith.constant 0 : i32
    %c0_i32_0 = arith.constant 0 : i32
    return %c0_i32, %arg0 : i32, i32
  }
}

module attributes {stable_mosaic.version = 11 : i64} {
  func.func @_tail_kernel(%arg0: i32, %arg1: memref<1x8x8x128xbf16, #tpu.memory_space<vmem>>, %arg2: memref<1x128xf32, #tpu.memory_space<vmem>>, %arg3: memref<1x128xf32, #tpu.memory_space<vmem>>, %arg4: memref<1x8x8x128xbf16, #tpu.memory_space<vmem>>, %arg5: memref<1x128xf32, #tpu.memory_space<vmem>>, %arg6: memref<1x128xf32, #tpu.memory_space<vmem>>, %arg7: memref<1x8x8x128xbf16, #tpu.memory_space<vmem>>) attributes {dimension_semantics = [#tpu.dimension_semantics<parallel>], iteration_bounds = array<i64: 2>, scalar_prefetch = 0 : i64, scratch_operands = 0 : i64, tpu.core_type = #tpu.core_type<tc>, window_params = [{transform_indices = @transform_0, window_bounds = array<i64: 1, 8, 8, 128>}, {pipeline_mode = #tpu.pipeline_mode<synchronous>, transform_indices = @transform_1, window_bounds = array<i64: 1, 128>}, {pipeline_mode = #tpu.pipeline_mode<synchronous>, transform_indices = @transform_2, window_bounds = array<i64: 1, 128>}, {transform_indices = @transform_3, window_bounds = array<i64: 1, 8, 8, 128>}, {pipeline_mode = #tpu.pipeline_mode<synchronous>, transform_indices = @transform_4, window_bounds = array<i64: 1, 128>}, {pipeline_mode = #tpu.pipeline_mode<synchronous>, transform_indices = @transform_5, window_bounds = array<i64: 1, 128>}, {transform_indices = @transform_6, window_bounds = array<i64: 1, 8, 8, 128>}]} {
    %c0 = arith.constant 0 : index
    %c0_0 = arith.constant 0 : index
    %c0_1 = arith.constant 0 : index
    %c0_2 = arith.constant 0 : index
    %0 = vector.load %arg4[%c0, %c0_0, %c0_1, %c0_2] : memref<1x8x8x128xbf16, #tpu.memory_space<vmem>>, vector<1x8x8x128xbf16>
    %1 = arith.extf %0 : vector<1x8x8x128xbf16> to vector<1x8x8x128xf32>
    %c0_3 = arith.constant 0 : index
    %c0_4 = arith.constant 0 : index
    %2 = vector.load %arg5[%c0_3, %c0_4] : memref<1x128xf32, #tpu.memory_space<vmem>>, vector<1x128xf32>
    %3 = vector.shape_cast %2 : vector<1x128xf32> to vector<1x1x1x128xf32>
    %4 = vector.broadcast %3 : vector<1x1x1x128xf32> to vector<1x8x8x128xf32>
    %5 = arith.mulf %1, %4 : vector<1x8x8x128xf32>
    %c0_5 = arith.constant 0 : index
    %c0_6 = arith.constant 0 : index
    %6 = vector.load %arg6[%c0_5, %c0_6] : memref<1x128xf32, #tpu.memory_space<vmem>>, vector<1x128xf32>
    %7 = vector.shape_cast %6 : vector<1x128xf32> to vector<1x1x1x128xf32>
    %8 = vector.broadcast %7 : vector<1x1x1x128xf32> to vector<1x8x8x128xf32>
    %9 = arith.addf %5, %8 : vector<1x8x8x128xf32>
    %c0_7 = arith.constant 0 : index
    %c0_8 = arith.constant 0 : index
    %c0_9 = arith.constant 0 : index
    %c0_10 = arith.constant 0 : index
    %10 = vector.load %arg1[%c0_7, %c0_8, %c0_9, %c0_10] : memref<1x8x8x128xbf16, #tpu.memory_space<vmem>>, vector<1x8x8x128xbf16>
    %11 = arith.extf %10 : vector<1x8x8x128xbf16> to vector<1x8x8x128xf32>
    %c0_11 = arith.constant 0 : index
    %c0_12 = arith.constant 0 : index
    %12 = vector.load %arg2[%c0_11, %c0_12] : memref<1x128xf32, #tpu.memory_space<vmem>>, vector<1x128xf32>
    %13 = vector.shape_cast %12 : vector<1x128xf32> to vector<1x1x1x128xf32>
    %14 = vector.broadcast %13 : vector<1x1x1x128xf32> to vector<1x8x8x128xf32>
    %15 = arith.mulf %11, %14 : vector<1x8x8x128xf32>
    %c0_13 = arith.constant 0 : index
    %c0_14 = arith.constant 0 : index
    %16 = vector.load %arg3[%c0_13, %c0_14] : memref<1x128xf32, #tpu.memory_space<vmem>>, vector<1x128xf32>
    %17 = vector.shape_cast %16 : vector<1x128xf32> to vector<1x1x1x128xf32>
    %18 = vector.broadcast %17 : vector<1x1x1x128xf32> to vector<1x8x8x128xf32>
    %19 = arith.addf %15, %18 : vector<1x8x8x128xf32>
    %20 = arith.addf %19, %9 : vector<1x8x8x128xf32>
    %cst = arith.constant 0.000000e+00 : f32
    %21 = vector.broadcast %cst : f32 to vector<1x8x8x128xf32>
    %22 = arith.maximumf %20, %21 : vector<1x8x8x128xf32>
    %23 = arith.truncf %22 : vector<1x8x8x128xf32> to vector<1x8x8x128xbf16>
    %c0_15 = arith.constant 0 : index
    %c0_16 = arith.constant 0 : index
    %c0_17 = arith.constant 0 : index
    %c0_18 = arith.constant 0 : index
    %24 = vector.load %arg7[%c0_15, %c0_16, %c0_17, %c0_18] : memref<1x8x8x128xbf16, #tpu.memory_space<vmem>>, vector<1x8x8x128xbf16>
    tpu.vector_store %arg7[%c0_15, %c0_16, %c0_17, %c0_18], %23 {strides = array<i32>} : memref<1x8x8x128xbf16, #tpu.memory_space<vmem>>, vector<1x8x8x128xbf16>,
    return
  }
  func.func @transform_0(%arg0: i32) -> (i32, i32, i32, i32) {
    %c0_i32 = arith.constant 0 : i32
    %c0_i32_0 = arith.constant 0 : i32
    %c0_i32_1 = arith.constant 0 : i32
    %c0_i32_2 = arith.constant 0 : i32
    return %arg0, %c0_i32, %c0_i32_0, %c0_i32_1 : i32, i32, i32, i32
  }
  func.func @transform_1(%arg0: i32) -> (i32, i32) {
    %c0_i32 = arith.constant 0 : i32
    %c0_i32_0 = arith.constant 0 : i32
    %c0_i32_1 = arith.constant 0 : i32
    return %c0_i32, %c0_i32_0 : i32, i32
  }
  func.func @transform_2(%arg0: i32) -> (i32, i32) {
    %c0_i32 = arith.constant 0 : i32
    %c0_i32_0 = arith.constant 0 : i32
    %c0_i32_1 = arith.constant 0 : i32
    return %c0_i32, %c0_i32_0 : i32, i32
  }
  func.func @transform_3(%arg0: i32) -> (i32, i32, i32, i32) {
    %c0_i32 = arith.constant 0 : i32
    %c0_i32_0 = arith.constant 0 : i32
    %c0_i32_1 = arith.constant 0 : i32
    %c0_i32_2 = arith.constant 0 : i32
    return %arg0, %c0_i32, %c0_i32_0, %c0_i32_1 : i32, i32, i32, i32
  }
  func.func @transform_4(%arg0: i32) -> (i32, i32) {
    %c0_i32 = arith.constant 0 : i32
    %c0_i32_0 = arith.constant 0 : i32
    %c0_i32_1 = arith.constant 0 : i32
    return %c0_i32, %c0_i32_0 : i32, i32
  }
  func.func @transform_5(%arg0: i32) -> (i32, i32) {
    %c0_i32 = arith.constant 0 : i32
    %c0_i32_0 = arith.constant 0 : i32
    %c0_i32_1 = arith.constant 0 : i32
    return %c0_i32, %c0_i32_0 : i32, i32
  }
  func.func @transform_6(%arg0: i32) -> (i32, i32, i32, i32) {
    %c0_i32 = arith.constant 0 : i32
    %c0_i32_0 = arith.constant 0 : i32
    %c0_i32_1 = arith.constant 0 : i32
    %c0_i32_2 = arith.constant 0 : i32
    return %arg0, %c0_i32, %c0_i32_0, %c0_i32_1 : i32, i32, i32, i32
  }
}

</mosaic_0001>

<bundles_post_ra>
// kernel: resblock_forward.4
= control target key start
LH: loop header
LB: loop body
LE: loop exit
PB: predicated region body
PF: predicated region fallthrough
CT: control target
= control target key end

     0   :  { %v578_v16 = vmov 0.0   ;;  %s694_s1 = inlined_call_operand.vmem [shape: bf16[128,128], index: 1, kind: input, shape index: {}]   ;;  %s695_s0 = inlined_call_operand.vmem [shape: bf16[128,128], index: 0, kind: input, shape index: {}]   ;;  %s696_s3 = inlined_call_operand.vmem [shape: f32[1,128], index: 3, kind: output, shape index: {1}]   ;;  %s697_s4 = inlined_call_operand.vmem [shape: f32[1,128], index: 4, kind: output, shape index: {2}]   ;;  %s698_s2 = inlined_call_operand.vmem [shape: bf16[128,128], index: 2, kind: output, shape index: {0}]  }
   0x1   :  { %v562_v0 = vld [vmem:[%s694_s1] sm:$0xff]   ;;  %v563_v1 = vld [vmem:[%s694_s1 + $0x8] sm:$0xff]   ;;  %v564_v2 = vld [vmem:[%s694_s1 + $0x10] sm:$0xff]   ;;  %19 = vst [vmem:[%s696_s3] sm:$0x1] %v578_v16 }
   0x2   :  { %513 = vmatprep.subr.bf16.mxu0 %v562_v0  ;;  %545 = vmatprep.subr.bf16.mxu1 %v562_v0  ;;  %v565_v3 = vld [vmem:[%s694_s1 + $0x18] sm:$0xff]   ;;  %v570_v4 = vld [vmem:[%s695_s0] sm:$0xff]   ;;  %v567_v7 = vld [vmem:[%s694_s1 + $0x28] sm:$0xff]   ;;  %20 = vst [vmem:[%s697_s4] sm:$0x1] %v578_v16 }
   0x3   :  { %514 = vmatpush3.bf16.msra.mxu0 %v562_v0  ;;  %553 = vmatpush3.bf16.msra.mxu1 %v562_v0  ;;  %v566_v5 = vld [vmem:[%s694_s1 + $0x20] sm:$0xff]   ;;  %v568_v8 = vld [vmem:[%s694_s1 + $0x30] sm:$0xff]   ;;  %v569_v9 = vld [vmem:[%s694_s1 + $0x38] sm:$0xff]  }
   0x4   :  { %515 = vmatprep.subr.bf16.mxu0 %v563_v1  ;;  %546 = vmatprep.subr.bf16.mxu1 %v563_v1  ;;  %v574_v6 = vld [vmem:[%s695_s0 + $0x20] sm:$0xff]   ;;  %v571_v10 = vld [vmem:[%s695_s0 + $0x8] sm:$0xff]   ;;  %v572_v12 = vld [vmem:[%s695_s0 + $0x10] sm:$0xff]  }
   0x5   :  { %529 = vmatprep.mubr.bf16.mxu0 %v570_v4  ;;  %537 = vmatprep.mubr.bf16.mxu1 %v574_v6  ;;  %v575_v11 = vld [vmem:[%s695_s0 + $0x28] sm:$0xff]   ;;  %v576_v13 = vld [vmem:[%s695_s0 + $0x30] sm:$0xff]   ;;  %v573_v14 = vld [vmem:[%s695_s0 + $0x18] sm:$0xff]  }
   0x6   :  { %v577_v15 = vld [vmem:[%s695_s0 + $0x38] sm:$0xff]  }
   0x7   :  { %516 = vmatpush3.bf16.msra.mxu0 %v563_v1  ;;  %554 = vmatpush3.bf16.msra.mxu1 %v563_v1 }
   0x8   :  { %517 = vmatprep.subr.bf16.mxu0 %v564_v2  ;;  %547 = vmatprep.subr.bf16.mxu1 %v564_v2 }
   0xb   :  { %518 = vmatpush3.bf16.msra.mxu0 %v564_v2  ;;  %555 = vmatpush3.bf16.msra.mxu1 %v564_v2 }
   0xc   :  { %519 = vmatprep.subr.bf16.mxu0 %v565_v3  ;;  %548 = vmatprep.subr.bf16.mxu1 %v565_v3 }
   0xf   :  { %520 = vmatpush3.bf16.msra.mxu0 %v565_v3  ;;  %556 = vmatpush3.bf16.msra.mxu1 %v565_v3 }
  0x10   :  { %521 = vmatprep.subr.bf16.mxu0 %v566_v5  ;;  %549 = vmatprep.subr.bf16.mxu1 %v566_v5 }
  0x13   :  { %522 = vmatpush3.bf16.msra.mxu0 %v566_v5  ;;  %557 = vmatpush3.bf16.msra.mxu1 %v566_v5 }
  0x14   :  { %523 = vmatprep.subr.bf16.mxu0 %v567_v7  ;;  %550 = vmatprep.subr.bf16.mxu1 %v567_v7 }
  0x17   :  { %524 = vmatpush3.bf16.msra.mxu0 %v567_v7  ;;  %558 = vmatpush3.bf16.msra.mxu1 %v567_v7 }
  0x18   :  { %525 = vmatprep.subr.bf16.mxu0 %v568_v8  ;;  %551 = vmatprep.subr.bf16.mxu1 %v568_v8 }
  0x1b   :  { %526 = vmatpush3.bf16.msra.mxu0 %v568_v8  ;;  %559 = vmatpush3.bf16.msra.mxu1 %v568_v8 }
  0x1c   :  { %527 = vmatprep.subr.bf16.mxu0 %v569_v9  ;;  %552 = vmatprep.subr.bf16.mxu1 %v569_v9 }
  0x1f   :  { %528 = vmatpush3.bf16.msra.mxu0 %v569_v9  ;;  %560 = vmatpush3.bf16.msra.mxu1 %v569_v9 }
  0x22   :  { %530 = vmatmul.mubr.bf16.vlgmr.msra.gmra.mrb[0].mxu0 %v571_v10  ;;  %538 = vmatmul.mubr.bf16.vlgmr.msra.gmra.mrb[0].mxu1 %v575_v11 }
  0x23   :  { %533 = vmatprep.mubr.bf16.mxu0 %v572_v12  ;;  %541 = vmatprep.mubr.bf16.mxu1 %v576_v13 }
  0x2a   :  { %534 = vmatmul.mubr.bf16.gmra.mrb[4].mxu0 %v573_v14  ;;  %542 = vmatmul.mubr.bf16.gmra.mrb[4].mxu1 %v577_v15 }
  0xf5   :  { %v531_v17 = vpop.f32.mrb[0].mxu0  ;;  %v539_v18 = vpop.f32.mrb[0].mxu1 }
  0xf6   :  { %v183_v19 = vpop.f32.mrb[1].mxu0  ;;  %v215_v20 = vpop.f32.mrb[1].mxu1  ;;  %v353_v32 = vmul.f32 %v531_v17, %v531_v17  ;;  %v361_v4 = vmul.f32 %v539_v18, %v539_v18 }
  0xf7   :  { %v532_v21 = vpop.f32.mrb[2].mxu0  ;;  %v540_v22 = vpop.f32.mrb[2].mxu1  ;;  %v351_v23 = vmul.f32 %v183_v19, %v183_v19  ;;  %v359_v62 = vmul.f32 %v215_v20, %v215_v20 }
  0xf8   :  { %v458_v24 = vpack.c.bf16 %v532_v21, %v531_v17  ;;  %v186_v25 = vpop.f32.mrb[3].mxu0  ;;  %v478_v26 = vpack.c.bf16 %v540_v22, %v539_v18  ;;  %v218_v27 = vpop.f32.mrb[3].mxu1  ;;  %v354_v35 = vmul.f32 %v532_v21, %v532_v21  ;;  %v362_v7 = vmul.f32 %v540_v22, %v540_v22 }
  0xf9   :  { %v453_v28 = vpack.c.bf16 %v186_v25, %v183_v19  ;;  %v327_v29 = vadd.f32 %v186_v25, %v183_v19  ;;  %v352_v30 = vmul.f32 %v186_v25, %v186_v25  ;;  %v473_v31 = vpack.c.bf16 %v218_v27, %v215_v20 }
  0xfa   :  { %490 = vst [vmem:[%s698_s2 + $0x8] sm:$0xff] %v458_v24   ;;  %494 = vst [vmem:[%s698_s2 + $0x28] sm:$0xff] %v478_v26   ;;  %v360_v3 = vmul.f32 %v218_v27, %v218_v27 }
  0xfb   :  { %454 = vst [vmem:[%s698_s2] sm:$0xff] %v453_v28   ;;  %v328_v33 = vadd.f32 %v531_v17, %v327_v29  ;;  %v367_v34 = vadd.f32 %v352_v30, %v351_v23  ;;  %493 = vst [vmem:[%s698_s2 + $0x20] sm:$0xff] %v473_v31  }
  0xfd   :  { %v368_v36 = vadd.f32 %v367_v34, %v353_v32  ;;  %v535_v37 = vpop.f32.mrb[4].mxu0  ;;  %v329_v38 = vadd.f32 %v532_v21, %v328_v33  ;;  %v543_v39 = vpop.f32.mrb[4].mxu1  ;;  %v326_v32 = vld [vmem:[%s696_s3] sm:$0x1] }
  0xfe   :  { %v199_v40 = vpop.f32.mrb[5].mxu0  ;;  %v231_v41 = vpop.f32.mrb[5].mxu1  ;;  %v357_v56 = vmul.f32 %v535_v37, %v535_v37  ;;  %v365_v16 = vmul.f32 %v543_v39, %v543_v39 }
  0xff   :  { %v330_v42 = vadd.f32 %v329_v38, %v199_v40  ;;  %v355_v43 = vmul.f32 %v199_v40, %v199_v40  ;;  %v369_v44 = vadd.f32 %v368_v36, %v354_v35  ;;  %v536_v45 = vpop.f32.mrb[6].mxu0  ;;  %v544_v46 = vpop.f32.mrb[6].mxu1  ;;  %v363_v10 = vmul.f32 %v231_v41, %v231_v41  ;;  %v350_v35 = vld [vmem:[%s697_s4] sm:$0x1] }
 0x100   :  { %v468_v47 = vpack.c.bf16 %v536_v45, %v535_v37  ;;  %v202_v48 = vpop.f32.mrb[7].mxu0  ;;  %v488_v49 = vpack.c.bf16 %v544_v46, %v543_v39  ;;  %v234_v50 = vpop.f32.mrb[7].mxu1  ;;  %v358_v59 = vmul.f32 %v536_v45, %v536_v45 }
 0x101   :  { %v370_v51 = vadd.f32 %v369_v44, %v355_v43  ;;  %v463_v52 = vpack.c.bf16 %v202_v48, %v199_v40  ;;  %v331_v53 = vadd.f32 %v330_v42, %v202_v48  ;;  %v356_v54 = vmul.f32 %v202_v48, %v202_v48 }
 0x102   :  { %492 = vst [vmem:[%s698_s2 + $0x18] sm:$0xff] %v468_v47   ;;  %496 = vst [vmem:[%s698_s2 + $0x38] sm:$0xff] %v488_v49   ;;  %v483_v55 = vpack.c.bf16 %v234_v50, %v231_v41  ;;  %v364_v15 = vmul.f32 %v234_v50, %v234_v50 }
 0x103   :  { %491 = vst [vmem:[%s698_s2 + $0x10] sm:$0xff] %v463_v52   ;;  %v332_v57 = vadd.f32 %v535_v37, %v331_v53  ;;  %v371_v58 = vadd.f32 %v370_v51, %v356_v54 }
 0x104   :  { %495 = vst [vmem:[%s698_s2 + $0x30] sm:$0xff] %v483_v55  }
 0x105   :  { %v372_v60 = vadd.f32 %v371_v58, %v357_v56  ;;  %v333_v61 = vadd.f32 %v536_v45, %v332_v57 }
 0x107   :  { %v334_v63 = vadd.f32 %v333_v61, %v215_v20  ;;  %v373_v0 = vadd.f32 %v372_v60, %v358_v59  ;;  %v366_v20 = vmul.f32 %v544_v46, %v544_v46 }
 0x109   :  { %v374_v1 = vadd.f32 %v373_v0, %v359_v62  ;;  %v335_v2 = vadd.f32 %v334_v63, %v218_v27 }
 0x10b   :  { %v336_v5 = vadd.f32 %v539_v18, %v335_v2  ;;  %v375_v6 = vadd.f32 %v374_v1, %v360_v3 }
 0x10d   :  { %v376_v8 = vadd.f32 %v375_v6, %v361_v4  ;;  %v337_v9 = vadd.f32 %v540_v22, %v336_v5 }
 0x10f   :  { %v338_v11 = vadd.f32 %v337_v9, %v231_v41  ;;  %v377_v12 = vadd.f32 %v376_v8, %v362_v7 }
 0x111   :  { %v378_v13 = vadd.f32 %v377_v12, %v363_v10  ;;  %v339_v14 = vadd.f32 %v338_v11, %v234_v50 }
 0x113   :  { %v340_v17 = vadd.f32 %v543_v39, %v339_v14  ;;  %v379_v19 = vadd.f32 %v378_v13, %v364_v15 }
 0x115   :  { %v341_v21 = vadd.f32 %v544_v46, %v340_v17  ;;  %v380_v23 = vadd.f32 %v379_v19, %v365_v16 }
 0x117   :  { %v342_v24 = vrot.slane %v341_v21, 4  ;;  %v381_v25 = vadd.f32 %v380_v23, %v366_v20 }
 0x119   :  { %v343_v26 = vadd.f32 %v342_v24, %v341_v21  ;;  %v382_v18 = vrot.slane %v381_v25, 4 }
 0x11b   :  { %v344_v27 = vrot.slane %v343_v26, 2  ;;  %v383_v28 = vadd.f32 %v382_v18, %v381_v25 }
 0x11d   :  { %v345_v29 = vadd.f32 %v344_v27, %v343_v26  ;;  %v384_v22 = vrot.slane %v383_v28, 2 }
 0x11f   :  { %v346_v30 = vrot.slane %v345_v29, 1  ;;  %v385_v31 = vadd.f32 %v384_v22, %v383_v28 }
 0x121   :  { %v347_v33 = vadd.f32 %v346_v30, %v345_v29  ;;  %v386_v34 = vrot.slane %v385_v31, 1 }
 0x123   :  { %v348_v36 = vadd.f32 %v347_v33, %v326_v32  ;;  %v387_v37 = vadd.f32 %v386_v34, %v385_v31 }
 0x125   :  { %349 = vst [vmem:[%s696_s3] sm:$0x1] %v348_v36  ;;  %v388_v38 = vadd.f32 %v387_v37, %v350_v35 }
 0x127   :  { %389 = vst [vmem:[%s697_s4] sm:$0x1] %v388_v38 }

// kernel: resblock_forward.7
= control target key start
LH: loop header
LB: loop body
LE: loop exit
PB: predicated region body
PF: predicated region fallthrough
CT: control target
= control target key end

     0   :  { %s595_s21 = smov 0   ;;  %s690_s0 = inlined_call_operand.vmem [shape: bf16[2,8,8,128], index: 0, kind: input, shape index: {}]   ;;  %s691_s1 = inlined_call_operand.vmem [shape: f32[1,128], index: 1, kind: input, shape index: {}]   ;;  %s692_s2 = inlined_call_operand.vmem [shape: f32[1,128], index: 2, kind: input, shape index: {}]   ;;  %s693_s3 = inlined_call_operand.vmem [shape: bf16[2,8,8,128], index: 3, kind: input, shape index: {}]   ;;  %s694_s4 = inlined_call_operand.vmem [shape: f32[1,128], index: 4, kind: input, shape index: {}]   ;;  %s695_s5 = inlined_call_operand.vmem [shape: f32[1,128], index: 5, kind: input, shape index: {}]   ;;  %s696_s6 = inlined_call_operand.vmem [shape: bf16[2,8,8,128], index: 6, kind: output, shape index: {}]  }
   0x1 LB: > { %s463_s22 = sadd.s32 4294967295, %s558_s21   ;;  %p467_p0 = scmp.ge.s32.totalorder %s558_s21, 1  ;;  %s558_s21 = sphi %s595_s21, %s16_s21  }
   0x2   : > { %p222_p1 = scmp.lt.s32.totalorder %s558_s21, 3 }
   0x4   : > { %p223_p2 = pnand %p467_p0, %p222_p1 }
   0x5   : > { %p257_p3 = scmp.lt.s32.totalorder (!%p223_p2), %s463_s22, 1  ;;  %v620_v0 = vld [vmem:[%s694_s4] ss:$0 sm:$0xff] (!%p223_p2) }
   0x6   : > { %226 = sbr.rel (%p223_p2) target bundleno = 42 (0x2a), region = 44  ;;  %v625_v1 = vld [vmem:[%s691_s1] ss:$0 sm:$0xff] (!%p223_p2) }
   0x7   : > { %v634_v10 = vld [vmem:[%s695_s5] ss:$0 sm:$0xff] (!%p223_p2) }
   0x8   : > { %v639_v11 = vld [vmem:[%s692_s2] ss:$0 sm:$0xff] (!%p223_p2) }
   0xd   : > { %s698_s22 = smov (!%p257_p3, %s463_s22), 1 }
   0xe   : > { %s603_s23 = sshll.u32 %s698_s22, 5 }
   0xf   : > { %s609_s26 = scalar_lea.vmem %s690_s0, %s603_s23  ;;  %s615_s29 = scalar_lea.vmem %s693_s3, %s603_s23 }
  0x10   : > { %v484_v2 = vld [vmem:[%s615_s29] sm:$0xff]   ;;  %v535_v4 = vld [vmem:[%s615_s29 + $0x8] sm:$0xff]   ;;  %v536_v24 = vld [vmem:[%s615_s29 + $0x10] sm:$0xff]   ;;  %s666_s16 = scalar_lea.vmem %s696_s6, %s603_s23 }
  0x11   : > { %v500_v3 = vld [vmem:[%s609_s26] sm:$0xff]   ;;  %v485_v5 = vunpack.c.l.bf16 %v484_v2  ;;  %v486_v6 = vunpack.c.h.bf16 %v484_v2  ;;  %v538_v9 = vld [vmem:[%s609_s26 + $0x8] sm:$0xff]   ;;  %v489_v12 = vunpack.c.l.bf16 %v535_v4  ;;  %v490_v13 = vunpack.c.h.bf16 %v535_v4  ;;  %v539_v29 = vld [vmem:[%s609_s26 + $0x10] sm:$0xff]  }
  0x12   : > { %v501_v7 = vunpack.c.l.bf16 %v500_v3  ;;  %v502_v8 = vunpack.c.h.bf16 %v500_v3  ;;  %v505_v14 = vunpack.c.l.bf16 %v538_v9  ;;  %v506_v15 = vunpack.c.h.bf16 %v538_v9  ;;  %v537_v42 = vld [vmem:[%s615_s29 + $0x18] sm:$0xff]  }
  0x13   : > { %v295_v16 = vmul.f32 %v485_v5, %v620_v0  ;;  %v296_v17 = vmul.f32 %v486_v6, %v620_v0  ;;  %v297_v20 = vmul.f32 %v489_v12, %v620_v0  ;;  %v298_v21 = vmul.f32 %v490_v13, %v620_v0  ;;  %v540_v51 = vld [vmem:[%s609_s26 + $0x18] sm:$0xff]  }
  0x14   : > { %v341_v18 = vmul.f32 %v501_v7, %v625_v1  ;;  %v342_v19 = vmul.f32 %v502_v8, %v625_v1  ;;  %v343_v22 = vmul.f32 %v505_v14, %v625_v1  ;;  %v344_v23 = vmul.f32 %v506_v15, %v625_v1 }
  0x15   : > { %v310_v25 = vadd.f32 %v634_v10, %v295_v16  ;;  %v311_v26 = vadd.f32 %v634_v10, %v296_v17  ;;  %v312_v30 = vadd.f32 %v634_v10, %v297_v20  ;;  %v313_v31 = vadd.f32 %v634_v10, %v298_v21 }
  0x16   : > { %v356_v27 = vadd.f32 %v639_v11, %v341_v18  ;;  %v357_v28 = vadd.f32 %v639_v11, %v342_v19  ;;  %v358_v32 = vadd.f32 %v639_v11, %v343_v22  ;;  %v359_v33 = vadd.f32 %v639_v11, %v344_v23 }
  0x17   : > { %v493_v36 = vunpack.c.l.bf16 %v536_v24  ;;  %v494_v37 = vunpack.c.h.bf16 %v536_v24  ;;  %v509_v40 = vunpack.c.l.bf16 %v539_v29  ;;  %v510_v41 = vunpack.c.h.bf16 %v539_v29 }
  0x18   : > { %v364_v34 = vadd.f32 %v356_v27, %v310_v25  ;;  %v365_v35 = vadd.f32 %v357_v28, %v311_v26  ;;  %v366_v38 = vadd.f32 %v358_v32, %v312_v30  ;;  %v367_v39 = vadd.f32 %v359_v33, %v313_v31 }
  0x19   : > { %v299_v45 = vmul.f32 %v493_v36, %v620_v0  ;;  %v300_v46 = vmul.f32 %v494_v37, %v620_v0  ;;  %v345_v49 = vmul.f32 %v509_v40, %v625_v1  ;;  %v346_v50 = vmul.f32 %v510_v41, %v625_v1 }
  0x1a   : > { %v372_v43 = vmax.f32 %v364_v34, 0.0  ;;  %v373_v44 = vmax.f32 %v365_v35, 0.0  ;;  %v374_v47 = vmax.f32 %v366_v38, 0.0  ;;  %v375_v48 = vmax.f32 %v367_v39, 0.0 }
  0x1b   : > { %v314_v53 = vadd.f32 %v634_v10, %v299_v45  ;;  %v315_v54 = vadd.f32 %v634_v10, %v300_v46  ;;  %v497_v55 = vunpack.c.l.bf16 %v537_v42  ;;  %v360_v57 = vadd.f32 %v639_v11, %v345_v49 }
  0x1c   : > { %v518_v52 = vpack.c.bf16 %v373_v44, %v372_v43  ;;  %v523_v56 = vpack.c.bf16 %v375_v48, %v374_v47  ;;  %v361_v58 = vadd.f32 %v639_v11, %v346_v50  ;;  %v498_v59 = vunpack.c.h.bf16 %v537_v42 }
  0x1d   : > { %v301_v60 = vmul.f32 %v497_v55, %v620_v0  ;;  %v513_v61 = vunpack.c.l.bf16 %v540_v51  ;;  %v514_v62 = vunpack.c.h.bf16 %v540_v51  ;;  %v368_v63 = vadd.f32 %v360_v57, %v314_v53 }
  0x1e   : > { %519 = vst [vmem:[%s666_s16] sm:$0xff] %v518_v52   ;;  %541 = vst [vmem:[%s666_s16 + $0x8] sm:$0xff] %v523_v56   ;;  %v369_v2 = vadd.f32 %v361_v58, %v315_v54  ;;  %v302_v3 = vmul.f32 %v498_v59, %v620_v0 }
  0x1f   : > { %v316_v4 = vadd.f32 %v634_v10, %v301_v60  ;;  %v347_v5 = vmul.f32 %v513_v61, %v625_v1  ;;  %v348_v6 = vmul.f32 %v514_v62, %v625_v1  ;;  %v376_v7 = vmax.f32 %v368_v63, 0.0 }
  0x20   : > { %v377_v8 = vmax.f32 %v369_v2, 0.0  ;;  %v317_v9 = vadd.f32 %v634_v10, %v302_v3 }
  0x21   : > { %v362_v12 = vadd.f32 %v639_v11, %v347_v5  ;;  %v363_v13 = vadd.f32 %v639_v11, %v348_v6 }
  0x22   : > { %v528_v14 = vpack.c.bf16 %v377_v8, %v376_v7 }
  0x23   : > { %v370_v15 = vadd.f32 %v362_v12, %v316_v4  ;;  %v371_v16 = vadd.f32 %v363_v13, %v317_v9 }
  0x24   : > { %542 = vst [vmem:[%s666_s16 + $0x10] sm:$0xff] %v528_v14  }
  0x25   : > { %v378_v0 = vmax.f32 %v370_v15, 0.0  ;;  %v379_v17 = vmax.f32 %v371_v16, 0.0 }
  0x27   : > { %v533_v18 = vpack.c.bf16 %v379_v17, %v378_v0 }
  0x29   : > { %543 = vst [vmem:[%s666_s16 + $0x18] sm:$0xff] %v533_v18  }
  0x2a PF: > { %s16_s21 = sadd.s32 1, %s558_s21  }
  0x2b   : > { %p13_p4 = scmp.ge.s32.totalorder %s16_s21, 4  }
  0x2d   :  { %15 = sbr.rel (!%p13_p4) target bundleno = 1 (0x1), region = 77 }

// kernel: resblock_forward.5
= control target key start
LH: loop header
LB: loop body
LE: loop exit
PB: predicated region body
PF: predicated region fallthrough
CT: control target
= control target key end

     0   :  { %s2368_s21 = smov 0   ;;  %s2370_s22 = smov 0   ;;  %s2925_s0 = inlined_call_operand.vmem [shape: bf16[2,10,10,128], index: 0, kind: input, shape index: {}]   ;;  %s2926_s1 = inlined_call_operand.vmem [shape: bf16[9,128,128], index: 1, kind: input, shape index: {}]   ;;  %s2927_s2 = inlined_call_operand.vmem [shape: f32[1,128], index: 2, kind: input, shape index: {}]   ;;  %s2928_s3 = inlined_call_operand.vmem [shape: f32[1,128], index: 3, kind: input, shape index: {}]   ;;  %s2929_s4 = inlined_call_operand.vmem [shape: bf16[2,8,8,128], index: 4, kind: output, shape index: {0}]   ;;  %s2930_s5 = inlined_call_operand.vmem [shape: f32[1,128], index: 5, kind: output, shape index: {1}]   ;;  %s2931_s6 = inlined_call_operand.vmem [shape: f32[1,128], index: 6, kind: output, shape index: {2}]  }
   0x1   :  { %s2372_s23 = smov 0  }
   0x2 LB: > { %s26_s24 = sadd.s32 1, %s2320_s22  ;;  %p1644_p0 = scmp.ge.s32.totalorder %s2324_s23, 1  ;;  %s2324_s23 = sphi %s2372_s23, %s17_s23   ;;  %s2320_s22 = sphi %s2370_s22, %s2944_s22   ;;  %s2316_s21 = sphi %s2368_s21, %s2943_s21  }
   0x3   : > { %p27_p1 = scmp.ge.s32.totalorder %s26_s24, 2  ;;  %p240_p2 = scmp.lt.s32.totalorder %s2324_s23, 3 }
   0x5   : > { %s2946_s24 = smov (%p27_p1, %s26_s24), 0  ;;  %p241_p3 = pnand %p1644_p0, %p240_p2 }
   0x6   : > { %p283_p4 = scmp.lt.s32.totalorder (!%p241_p3), %s2316_s21, 1  ;;  %p1648_p5 = scmp.ne.s32.totalorder (!%p241_p3), %s2316_s21, 0 }
   0x7   : > { %244 = sbr.rel (%p241_p3) target bundleno = 422 (0x1a6), region = 36 }
   0xe   : > { %s284_s25 = scalar_select %p283_p4, %s2316_s21, 1 }
   0xf   : > { %310 = sbr.rel (%p1648_p5) target bundleno = 22 (0x16), region = 40  ;;  %v2330_v0 = vmov (!%p1648_p5), 0.0  }
  0x10   : > { %s2190_s26 = smul.u32 80, %s284_s25  ;;  %s1898_s27 = sshll.u32 %s284_s25, 5  ;;  %311 = vst [vmem:[%s2930_s5] sm:$0x1] (!%p1648_p5), %v2330_v0  ;;  %312 = vst [vmem:[%s2931_s6] sm:$0x1] (!%p1648_p5), %v2330_v0 }
  0x11   : > { %s2389_s30 = scalar_lea.vmem %s2929_s4, %s1898_s27 }
  0x12   : > { %s2394_s9 = scalar_lea.vmem %s2925_s0, %s2190_s26 }
  0x16 PF: > { %v2405_v1 = vld [vmem:[%s2927_s2] ss:$0 sm:$0xff]  ;;  %v315_v3 = vlaneseq  ;;  %s2419_s18 = smov 0  }
  0x17   : > { %v2410_v2 = vld [vmem:[%s2928_s3] ss:$0 sm:$0xff] }
  0x18   : > { %v2412_v4 = vshrl.u32 %v315_v3, 7 }
  0x1a   : > { %vm317_vm0 = vcmp.ge.s32.totalorder %v2412_v4, 1  ;;  %v2416_v5 = vadd.s32 2, %v2412_v4 }
  0x1c   : > { %vm326_vm1 = vcmp.le.s32.totalorder %v2416_v5, 8 }
  0x1d LB: >> { %v2226_v6 = vld [vmem:[%s2926_s1 + $0x40] sm:$0xff]   ;;  %v2331_v7 = vmov 0.0   ;;  %v2228_v9 = vld [vmem:[%s2926_s1 + $0x48] sm:$0xff]   ;;  %vm2332_vm2 = vmmov 0   ;;  %v2230_v11 = vld [vmem:[%s2926_s1 + $0x50] sm:$0xff]   ;;  %s1899_s12 = sshll.u32 %s2328_s18, 3  ;;  %s2328_s18 = sphi %s2419_s18, %s2942_s18  }
  0x1e   : >> { %1981 = vmatprep.subr.bf16.mxu1 %v2331_v7  ;;  %2061 = vmatprep.subr.bf16.mxu0 %v2331_v7  ;;  %v2227_v8 = vld [vmem:[%s2926_s1 + $0x100] sm:$0xff]   ;;  %v2229_v10 = vld [vmem:[%s2926_s1 + $0x108] sm:$0xff]   ;;  %v2231_v12 = vld [vmem:[%s2926_s1 + $0x110] sm:$0xff]   ;;  %s2457_s15 = sadd.s32 1, %s2328_s18   ;;  %s2464_s19 = scalar_lea.vmem %s2394_s9, %s1899_s12  ;;  %vm392_vm3 = vcmask 1046528   ;;  %vm601_vm9 = vcmask 1045504  }
  0x1f   : >> { %1982 = vmatpush3.bf16.msra.mxu1 %v2226_v6  ;;  %1997 = vmatprep.mubr.msk.bf16.mxu1 %vm2332_vm2, %v2331_v7  ;;  %v2232_v13 = vld [vmem:[%s2926_s1 + $0x58] sm:$0xff]   ;;  %p338_p6 = scmp.ge.s32.totalorder %s2328_s18, 1  ;;  %p339_p7 = scmp.le.s32.totalorder %s2328_s18, 8  ;;  %v2234_v15 = vld [vmem:[%s2926_s1 + $0x60] sm:$0xff]   ;;  %v2236_v22 = vld [vmem:[%s2926_s1 + $0x68] sm:$0xff]  }
  0x20   : >> { %2062 = vmatpush3.bf16.msra.mxu0 %v2227_v8  ;;  %1983 = vmatprep.subr.bf16.mxu1 %v2331_v7  ;;  %v2233_v14 = vld [vmem:[%s2926_s1 + $0x118] sm:$0xff]   ;;  %p719_p8 = scmp.ge.s32.totalorder %s2457_s15, 1  ;;  %p720_p9 = scmp.le.s32.totalorder %s2457_s15, 8  ;;  %v2235_v16 = vld [vmem:[%s2926_s1 + $0x120] sm:$0xff]   ;;  %v1750_v23 = vld [vmem:[%s2464_s19 + $0xc] sm:$0x1] }
  0x21   : >> { %2063 = vmatprep.subr.bf16.mxu0 %v2331_v7  ;;  %2077 = vmatprep.mubr.msk.bf16.mxu0 %vm2332_vm2, %v2331_v7  ;;  %v337_v17 = vld [vmem:[%s2464_s19] ss:$8 sps:$4 sm:$0xff]   ;;  %p2480_p10 = pnand %p339_p7, %p338_p6  ;;  %v382_v18 = vld [vmem:[%s2464_s19 + $0x4] sm:$0x1]  ;;  %v844_v27 = vunpack.c.l.bf16 %v1750_v23  ;;  %v2238_v32 = vld [vmem:[%s2926_s1 + $0x70] sm:$0xff]   ;;  %s1089_s16 = sadd.s32 2, %s2328_s18 }
  0x22   : >> { %v342_v19 = vunpack.c.l.bf16 %v337_v17  ;;  %v383_v20 = vunpack.c.l.bf16 %v382_v18  ;;  %p2487_p11 = pnand %p720_p9, %p719_p8  ;;  %v843_v21 = vunpack.c.h.bf16 %v337_v17  ;;  %v2237_v24 = vld [vmem:[%s2926_s1 + $0x128] sm:$0xff]   ;;  %v2239_v34 = vld [vmem:[%s2926_s1 + $0x130] sm:$0xff]   ;;  %v2240_v40 = vld [vmem:[%s2926_s1 + $0x78] sm:$0xff]   ;;  %p2691_p12 = scmp.ge.s32.totalorder %s1089_s16, 1 }
  0x23   : >> { %1984 = vmatpush3.bf16.msra.mxu1 %v2228_v9  ;;  %s1653_s11 = scalar_select %p2480_p10, 0, 1  ;;  %v846_v31 = vmul.f32 %v2405_v1, %v844_v27  ;;  %v2241_v45 = vld [vmem:[%s2926_s1 + $0x138] sm:$0xff]   ;;  %v2242_v49 = vld [vmem:[%s2926_s1] sm:$0xff]   ;;  %v2244_v54 = vld [vmem:[%s2926_s1 + $0x8] sm:$0xff]  }
  0x24   : >> { %2064 = vmatpush3.bf16.msra.mxu0 %v2229_v10  ;;  %1985 = vmatprep.subr.bf16.mxu1 %v2331_v7  ;;  %v349_v25 = vmul.f32 %v2405_v1, %v342_v19  ;;  %v384_v26 = vmul.f32 %v2405_v1, %v383_v20  ;;  %v845_v28 = vmul.f32 %v2405_v1, %v843_v21  ;;  %s1721_s12 = scalar_select %p2487_p11, 0, 1  ;;  %v2243_v52 = vld [vmem:[%s2926_s1 + $0x140] sm:$0xff]   ;;  %v2245_v55 = vld [vmem:[%s2926_s1 + $0x148] sm:$0xff]   ;;  %v2246_v57 = vld [vmem:[%s2926_s1 + $0x10] sm:$0xff]  }
  0x25   : >> { %2065 = vmatprep.subr.bf16.mxu0 %v2331_v7  ;;  %v2524_v37 = vadd.f32 %v2410_v2, %v846_v31  ;;  %v2527_v38 = vstv %s1653_s11  ;;  %v1778_v56 = vld [vmem:[%s2464_s19 + $0x8] sm:$0xe]  ;;  %v2247_v58 = vld [vmem:[%s2926_s1 + $0x150] sm:$0xff]   ;;  %v2248_v60 = vld [vmem:[%s2926_s1 + $0x18] sm:$0xff]   ;;  %p2699_p13 = scmp.le.s32.totalorder %s1089_s16, 8  ;;  %s1893_s27 = sshll.u32 %s2328_s18, 2 }
  0x26   : >> { %v356_v29 = vadd.f32 %v2410_v2, %v349_v25  ;;  %v2507_v30 = vadd.f32 %v2410_v2, %v384_v26  ;;  %v847_v33 = vadd.f32 %v2410_v2, %v845_v28  ;;  %v2535_v43 = vstv %s1721_s12  ;;  %v2249_v61 = vld [vmem:[%s2926_s1 + $0x158] sm:$0xff]   ;;  %v2250_v63 = vld [vmem:[%s2926_s1 + $0x20] sm:$0xff]   ;;  %v2252_v6 = vld [vmem:[%s2926_s1 + $0x28] sm:$0xff]   ;;  %s1466_s28 = scalar_lea.vmem %s2389_s30, %s1893_s27  ;;  %p330_p1 = scmp.ge.s32.totalorder %s2457_s15, 8  }
  0x27   : >> { %1986 = vmatpush3.bf16.msra.mxu1 %v2230_v11  ;;  %v850_v44 = vmax.f32 %v2524_v37, 0.0  ;;  %vm360_vm4 = vcmp.eq.s32.totalorder %v2527_v38, 1  ;;  %vm729_vm5 = vcmp.eq.s32.totalorder %v2535_v43, 1  ;;  %v969_v59 = vunpack.c.l.bf16 %v1778_v56  ;;  %v2251_v0 = vld [vmem:[%s2926_s1 + $0x160] sm:$0xff]   ;;  %v2253_v8 = vld [vmem:[%s2926_s1 + $0x168] sm:$0xff]   ;;  %v2256_v18 = vld [vmem:[%s2926_s1 + $0x38] sm:$0xff]   ;;  %p1096_p0 = pnand %p2699_p13, %p2691_p12  ;;  %s2942_s18 = smov %s2457_s15 }
  0x28   : >> { %2066 = vmatpush3.bf16.msra.mxu0 %v2231_v12  ;;  %1987 = vmatprep.subr.bf16.mxu1 %v2331_v7  ;;  %v2520_v35 = vmax.f32 %v356_v29, 0.0  ;;  %v386_v36 = vmax.f32 %v2507_v30, 0.0  ;;  %v849_v39 = vmax.f32 %v847_v33, 0.0  ;;  %vm1678_vm6 = vmpackc.low %vm360_vm4, %vm360_vm4  ;;  %v592_v10 = vld [vmem:[%s2464_s19] sm:$0xe]  ;;  %v2260_v31 = vld [vmem:[%s2926_s1 + $0x88] sm:$0xff]  }
  0x29   : >> { %2067 = vmatprep.subr.bf16.mxu0 %v2331_v7  ;;  %v857_v48 = vrot.slane %v850_v44, 1  ;;  %vm1775_vm7 = vmpackc.low %vm729_vm5, %vm729_vm5  ;;  %v970_v62 = vmul.f32 %v2405_v1, %v969_v59  ;;  %v593_v11 = vunpack.c.l.bf16 %v592_v10  ;;  %v978_v12 = vrot.slane %v850_v44, 2  ;;  %v2258_v26 = vld [vmem:[%s2926_s1 + $0x80] sm:$0xff]   ;;  %v2262_v33 = vld [vmem:[%s2926_s1 + $0x90] sm:$0xff]   ;;  %s1808_s14 = scalar_select %p1096_p0, 0, 1 }
  0x2a   : >> { %v393_v41 = vrot.slane %v2520_v35, 1  ;;  %v394_v42 = vrot.slane %v386_v36, 1  ;;  %v856_v46 = vrot.slane %v849_v39, 1  ;;  %vm2622_vm8 = vmand %vm317_vm0, %vm360_vm4  ;;  %v603_v20 = vrot.slane %v386_v36, 2  ;;  %v2259_v29 = vld [vmem:[%s2926_s1 + $0x180] sm:$0xff]   ;;  %v2278_v21 = vld [vmem:[%s2926_s1 + $0xd0] sm:$0xff]  }
  0x2b   : >> { %1988 = vmatpush3.bf16.msra.mxu1 %v2232_v13  ;;  %v971_v3 = vadd.f32 %v2410_v2, %v970_v62  ;;  %v2254_v13 = vld [vmem:[%s2926_s1 + $0x30] sm:$0xff]   ;;  %vm2636_vm10 = vmand %vm326_vm1, %vm729_vm5  ;;  %v1690_v25 = vpack.c.bf16 %v2520_v35, %v2520_v35  ;;  %v2274_v38 = vld [vmem:[%s2926_s1 + $0xc0] sm:$0xff]  }
  0x2c   : >> { %2068 = vmatpush3.bf16.msra.mxu0 %v2233_v14  ;;  %1989 = vmatprep.subr.bf16.mxu1 %v2331_v7  ;;  %v395_v47 = vsel %vm392_vm3, %v393_v41, %v394_v42  ;;  %v858_v51 = vsel %vm392_vm3, %v856_v46, %v857_v48  ;;  %v2255_v14 = vld [vmem:[%s2926_s1 + $0x170] sm:$0xff]   ;;  %vm1689_vm11 = vmpackc.low %vm2622_vm8, %vm2622_vm8  ;;  %v2265_v42 = vld [vmem:[%s2926_s1 + $0x198] sm:$0xff]  }
  0x2d   : >> { %2069 = vmatprep.subr.bf16.mxu0 %v2331_v7  ;;  %v1679_v50 = vpack.c.bf16 %v395_v47, %v395_v47  ;;  %v1776_v53 = vpack.c.bf16 %v858_v51, %v858_v51  ;;  %v972_v9 = vmax.f32 %v971_v3, 0.0  ;;  %vm1803_vm12 = vmpackc.low %vm2636_vm10, %vm2636_vm10  ;;  %v2263_v35 = vld [vmem:[%s2926_s1 + $0x190] sm:$0xff]   ;;  %v1103_v3 = vstv %s1808_s14  ;;  %v2290_v43 = vld [vmem:[%s2926_s1 + $0x200] sm:$0xff]  }
  0x2e   : >> { %v1837_v36 = vld [vmem:[%s2464_s19 + $0x14] sm:$0x1]  ;;  %vm2753_vm13 = vcmp.eq.s32.totalorder %v1103_v3, 1  ;;  %vm597_vm14 = vmand %vm326_vm1, %vm360_vm4 }
  0x2f   : >> { %1990 = vmatpush3.bf16.msra.mxu1 %v2234_v15  ;;  %v977_v15 = vrot.slane %v972_v9, 2  ;;  %v1219_v39 = vunpack.c.l.bf16 %v1837_v36  ;;  %vm1105_vm15 = vmand %vm317_vm0, %vm2753_vm13  ;;  %v2289_v36 = vld [vmem:[%s2926_s1 + $0x1f8] sm:$0xff]  }
  0x30   : >> { %2070 = vmatpush3.bf16.msra.mxu0 %v2235_v16  ;;  %1991 = vmatprep.subr.bf16.mxu1 %v2331_v7  ;;  %v594_v16 = vmul.f32 %v2405_v1, %v593_v11  ;;  %vm1833_vm4 = vmpackc.low %vm1105_vm15, %vm1105_vm15 }
  0x31   : >> { %2071 = vmatprep.subr.bf16.mxu0 %v2331_v7  ;;  %v979_v23 = vsel %vm601_vm9, %v977_v15, %v978_v12  ;;  %v1221_v44 = vmul.f32 %v2405_v1, %v1219_v39  ;;  %v2272_v12 = vld [vmem:[%s2926_s1 + $0xb8] sm:$0xff]   ;;  %vm1862_vm8 = vmpackc.low %vm2753_vm13, %vm2753_vm13 }
  0x32   : >> { %v595_v19 = vadd.f32 %v2410_v2, %v594_v16  ;;  %v1804_v28 = vpack.c.bf16 %v979_v23, %v979_v23  ;;  %v2280_v23 = vld [vmem:[%s2926_s1 + $0xd8] sm:$0xff]  }
  0x33   : >> { %1992 = vmatpush3.bf16.msra.mxu1 %v2236_v22  ;;  %v2257_v22 = vld [vmem:[%s2926_s1 + $0x178] sm:$0xff]   ;;  %v1223_v47 = vadd.f32 %v2410_v2, %v1221_v44  ;;  %v2294_v44 = vld [vmem:[%s2926_s1 + $0x220] sm:$0xff]  }
  0x34   : >> { %2072 = vmatpush3.bf16.msra.mxu0 %v2237_v24  ;;  %1993 = vmatprep.subr.bf16.mxu1 %v2331_v7  ;;  %v596_v24 = vmax.f32 %v595_v19, 0.0  ;;  %v2276_v19 = vld [vmem:[%s2926_s1 + $0xc8] sm:$0xff]  }
  0x35   : >> { %2073 = vmatprep.subr.bf16.mxu0 %v2331_v7  ;;  %v1225_v51 = vmax.f32 %v1223_v47, 0.0  ;;  %v2297_v47 = vld [vmem:[%s2926_s1 + $0x238] sm:$0xff]  }
  0x36   : >> { %v602_v27 = vrot.slane %v596_v24, 2  ;;  %v2281_v24 = vld [vmem:[%s2926_s1 + $0x1d8] sm:$0xff]  }
  0x37   : >> { %1994 = vmatpush3.bf16.msra.mxu1 %v2238_v32  ;;  %v2261_v32 = vld [vmem:[%s2926_s1 + $0x188] sm:$0xff]   ;;  %v1353_v9 = vrot.slane %v1225_v51, 2 }
  0x38   : >> { %2074 = vmatpush3.bf16.msra.mxu0 %v2239_v34  ;;  %1995 = vmatprep.subr.bf16.mxu1 %v2331_v7  ;;  %v2662_v30 = vsel %vm601_vm9, %v602_v27, %v603_v20  ;;  %v1836_v34 = vld [vmem:[%s2464_s19 + $0x10] sm:$0xf]  ;;  %v2277_v20 = vld [vmem:[%s2926_s1 + $0x1c8] sm:$0xff]   ;;  %v2283_v27 = vld [vmem:[%s2926_s1 + $0x1e0] sm:$0xff]  }
  0x39   : >> { %2075 = vmatprep.subr.bf16.mxu0 %v2331_v7  ;;  %v1218_v37 = vunpack.c.l.bf16 %v1836_v34  ;;  %v1717_v16 = vpack.c.bf16 %v2662_v30, %v2662_v30  ;;  %v2285_v30 = vld [vmem:[%s2926_s1 + $0x1e8] sm:$0xff]  }
  0x3b   : >> { %1996 = vmatpush3.bf16.msra.mxu1 %v2240_v40  ;;  %v2264_v40 = vld [vmem:[%s2926_s1 + $0x98] sm:$0xff]   ;;  %v1220_v41 = vmul.f32 %v2405_v1, %v1218_v37 }
  0x3c   : >> { %2076 = vmatpush3.bf16.msra.mxu0 %v2241_v45  ;;  %2001 = vmatprep.subr.bf16.mxu1 %v2331_v7  ;;  %v2706_v45 = vld [vmem:[%s2464_s19 + $0x8] ss:$8 sps:$4 sm:$0xff]  }
  0x3d   : >> { %2081 = vmatprep.subr.bf16.mxu0 %v2331_v7  ;;  %v1222_v46 = vadd.f32 %v2410_v2, %v1220_v41  ;;  %v2292_v41 = vld [vmem:[%s2926_s1 + $0x210] sm:$0xff]  }
  0x3e   : >> { %1998 = vmatmul.mubr.msk.bf16.vlgmr.msra.gmra.mrb[0].mxu1 %vm1678_vm6, %v1679_v50  ;;  %v1098_v50 = vunpack.c.h.bf16 %v2706_v45  ;;  %vm730_vm6 = vmand %vm317_vm0, %vm729_vm5 }
  0x3f   : >> { %2002 = vmatpush3.bf16.msra.mxu1 %v2242_v49  ;;  %2078 = vmatmul.mubr.msk.bf16.vlgmr.msra.gmra.mrb[0].mxu0 %vm1775_vm7, %v1776_v53  ;;  %v1224_v48 = vmax.f32 %v1222_v46, 0.0  ;;  %v2266_v49 = vld [vmem:[%s2926_s1 + $0xa0] sm:$0xff]   ;;  %vm1746_vm7 = vmpackc.low %vm730_vm6, %vm730_vm6  ;;  %v2296_v46 = vld [vmem:[%s2926_s1 + $0x230] sm:$0xff]  }
  0x40   : >> { %2082 = vmatpush3.bf16.msra.mxu0 %v2243_v52  ;;  %2003 = vmatprep.subr.bf16.mxu1 %v2331_v7  ;;  %v2267_v52 = vld [vmem:[%s2926_s1 + $0x1a0] sm:$0xff]  }
  0x41   : >> { %2083 = vmatprep.subr.bf16.mxu0 %v2331_v7  ;;  %2017 = vmatprep.mubr.msk.bf16.mxu1 %vm2332_vm2, %v2331_v7  ;;  %v1231_v53 = vrot.slane %v1224_v48, 1 }
  0x42   : >> { %2097 = vmatprep.mubr.msk.bf16.mxu0 %vm2332_vm2, %v2331_v7 }
  0x43   : >> { %2004 = vmatpush3.bf16.msra.mxu1 %v2244_v54  ;;  %v1232_v54 = vrot.slane %v1225_v51, 1 }
  0x44   : >> { %2084 = vmatpush3.bf16.msra.mxu0 %v2245_v55  ;;  %2005 = vmatprep.subr.bf16.mxu1 %v2331_v7  ;;  %v1865_v55 = vld [vmem:[%s2464_s19 + $0x10] sm:$0xe] }
  0x45   : >> { %2085 = vmatprep.subr.bf16.mxu0 %v2331_v7  ;;  %v1344_v56 = vunpack.c.l.bf16 %v1865_v55  ;;  %v2735_v59 = vsel %vm392_vm3, %v1231_v53, %v1232_v54  ;;  %vm1716_vm3 = vmpackc.low %vm597_vm14, %vm597_vm14 }
  0x46   : >> { %v1863_v39 = vpack.c.bf16 %v2735_v59, %v2735_v59 }
  0x47   : >> { %2006 = vmatpush3.bf16.msra.mxu1 %v2246_v57  ;;  %v2268_v57 = vld [vmem:[%s2926_s1 + $0xa8] sm:$0xff]  }
  0x48   : >> { %2086 = vmatpush3.bf16.msra.mxu0 %v2247_v58  ;;  %2007 = vmatprep.subr.bf16.mxu1 %v2331_v7  ;;  %v1099_v58 = vmul.f32 %v2405_v1, %v1098_v50 }
  0x49   : >> { %2087 = vmatprep.subr.bf16.mxu0 %v2331_v7 }
  0x4b   : >> { %2008 = vmatpush3.bf16.msra.mxu1 %v2248_v60  ;;  %v2269_v60 = vld [vmem:[%s2926_s1 + $0x1a8] sm:$0xff]  }
  0x4c   : >> { %2088 = vmatpush3.bf16.msra.mxu0 %v2249_v61  ;;  %2009 = vmatprep.subr.bf16.mxu1 %v2331_v7  ;;  %v1345_v61 = vmul.f32 %v2405_v1, %v1344_v56 }
  0x4d   : >> { %2089 = vmatprep.subr.bf16.mxu0 %v2331_v7 }
  0x4e   : >> { %v1346_v62 = vadd.f32 %v2410_v2, %v1345_v61 }
  0x4f   : >> { %2010 = vmatpush3.bf16.msra.mxu1 %v2250_v63  ;;  %v2270_v63 = vld [vmem:[%s2926_s1 + $0xb0] sm:$0xff]  }
  0x50   : >> { %2090 = vmatpush3.bf16.msra.mxu0 %v2251_v0  ;;  %2011 = vmatprep.subr.bf16.mxu1 %v2331_v7  ;;  %v1100_v0 = vadd.f32 %v2410_v2, %v1099_v58 }
  0x51   : >> { %2091 = vmatprep.subr.bf16.mxu0 %v2331_v7 }
  0x53   : >> { %2012 = vmatpush3.bf16.msra.mxu1 %v2252_v6  ;;  %v2271_v6 = vld [vmem:[%s2926_s1 + $0x1b0] sm:$0xff]  }
  0x54   : >> { %2092 = vmatpush3.bf16.msra.mxu0 %v2253_v8  ;;  %2013 = vmatprep.subr.bf16.mxu1 %v2331_v7  ;;  %v1347_v8 = vmax.f32 %v1346_v62, 0.0 }
  0x55   : >> { %2093 = vmatprep.subr.bf16.mxu0 %v2331_v7 }
  0x56   : >> { %v1352_v11 = vrot.slane %v1347_v8, 2 }
  0x57   : >> { %2014 = vmatpush3.bf16.msra.mxu1 %v2254_v13  ;;  %v1101_v13 = vmax.f32 %v1100_v0, 0.0 }
  0x58   : >> { %2094 = vmatpush3.bf16.msra.mxu0 %v2255_v14  ;;  %2015 = vmatprep.subr.bf16.mxu1 %v2331_v7  ;;  %v2273_v14 = vld [vmem:[%s2926_s1 + $0x1b8] sm:$0xff]   ;;  %v2769_v15 = vsel %vm601_vm9, %v1352_v11, %v1353_v9  ;;  %v1468_v9 = vld [vmem:[%s2930_s5] sm:$0x1] }
  0x59   : >> { %2095 = vmatprep.subr.bf16.mxu0 %v2331_v7  ;;  %v1834_v17 = vpack.c.bf16 %v1101_v13, %v1101_v13  ;;  %v1891_v48 = vpack.c.bf16 %v2769_v15, %v2769_v15 }
  0x5b   : >> { %2016 = vmatpush3.bf16.msra.mxu1 %v2256_v18  ;;  %v2275_v18 = vld [vmem:[%s2926_s1 + $0x1c0] sm:$0xff]  }
  0x5c   : >> { %2096 = vmatpush3.bf16.msra.mxu0 %v2257_v22  ;;  %2021 = vmatprep.subr.bf16.mxu1 %v2331_v7  ;;  %v2279_v22 = vld [vmem:[%s2926_s1 + $0x1d0] sm:$0xff]  }
  0x5d   : >> { %2101 = vmatprep.subr.bf16.mxu0 %v2331_v7 }
  0x5e   : >> { %2018 = vmatmul.mubr.msk.bf16.vlgmr.msra.gmra.mrb[0].mxu1 %vm1689_vm11, %v1690_v25  ;;  %v723_v25 = vunpack.c.l.bf16 %v2706_v45  ;;  %v2295_v45 = vld [vmem:[%s2926_s1 + $0x228] sm:$0xff]  }
  0x5f   : >> { %2022 = vmatpush3.bf16.msra.mxu1 %v2258_v26  ;;  %2098 = vmatmul.mubr.msk.bf16.vlgmr.msra.gmra.mrb[0].mxu0 %vm1803_vm12, %v1804_v28  ;;  %v2282_v26 = vld [vmem:[%s2926_s1 + $0xe0] sm:$0xff]  }
  0x60   : >> { %2102 = vmatpush3.bf16.msra.mxu0 %v2259_v29  ;;  %2023 = vmatprep.subr.bf16.mxu1 %v2331_v7  ;;  %v724_v28 = vmul.f32 %v2405_v1, %v723_v25  ;;  %v2284_v29 = vld [vmem:[%s2926_s1 + $0xe8] sm:$0xff]  }
  0x61   : >> { %2103 = vmatprep.subr.bf16.mxu0 %v2331_v7  ;;  %2037 = vmatprep.mubr.msk.bf16.mxu1 %vm2332_vm2, %v2331_v7 }
  0x62   : >> { %2117 = vmatprep.mubr.msk.bf16.mxu0 %vm2332_vm2, %v2331_v7 }
  0x63   : >> { %2024 = vmatpush3.bf16.msra.mxu1 %v2260_v31  ;;  %v725_v31 = vadd.f32 %v2410_v2, %v724_v28 }
  0x64   : >> { %2104 = vmatpush3.bf16.msra.mxu0 %v2261_v32  ;;  %2025 = vmatprep.subr.bf16.mxu1 %v2331_v7  ;;  %v2286_v32 = vld [vmem:[%s2926_s1 + $0xf0] sm:$0xff]  }
  0x65   : >> { %2105 = vmatprep.subr.bf16.mxu0 %v2331_v7  ;;  %v726_v34 = vmax.f32 %v725_v31, 0.0 }
  0x67   : >> { %2026 = vmatpush3.bf16.msra.mxu1 %v2262_v33  ;;  %v2287_v33 = vld [vmem:[%s2926_s1 + $0x1f0] sm:$0xff]   ;;  %v1747_v37 = vpack.c.bf16 %v726_v34, %v726_v34 }
  0x68   : >> { %2106 = vmatpush3.bf16.msra.mxu0 %v2263_v35  ;;  %2027 = vmatprep.subr.bf16.mxu1 %v2331_v7  ;;  %v2288_v35 = vld [vmem:[%s2926_s1 + $0xf8] sm:$0xff]  }
  0x69   : >> { %2107 = vmatprep.subr.bf16.mxu0 %v2331_v7 }
  0x6b   : >> { %2028 = vmatpush3.bf16.msra.mxu1 %v2264_v40  ;;  %v2291_v40 = vld [vmem:[%s2926_s1 + $0x208] sm:$0xff]  }
  0x6c   : >> { %2108 = vmatpush3.bf16.msra.mxu0 %v2265_v42  ;;  %2029 = vmatprep.subr.bf16.mxu1 %v2331_v7  ;;  %v2293_v42 = vld [vmem:[%s2926_s1 + $0x218] sm:$0xff]  }
  0x6d   : >> { %2109 = vmatprep.subr.bf16.mxu0 %v2331_v7 }
  0x6f   : >> { %2030 = vmatpush3.bf16.msra.mxu1 %v2266_v49 }
  0x70   : >> { %2110 = vmatpush3.bf16.msra.mxu0 %v2267_v52  ;;  %2031 = vmatprep.subr.bf16.mxu1 %v2331_v7 }
  0x71   : >> { %2111 = vmatprep.subr.bf16.mxu0 %v2331_v7 }
  0x73   : >> { %2032 = vmatpush3.bf16.msra.mxu1 %v2268_v57 }
  0x74   : >> { %2112 = vmatpush3.bf16.msra.mxu0 %v2269_v60  ;;  %2033 = vmatprep.subr.bf16.mxu1 %v2331_v7 }
  0x75   : >> { %2113 = vmatprep.subr.bf16.mxu0 %v2331_v7 }
  0x77   : >> { %2034 = vmatpush3.bf16.msra.mxu1 %v2270_v63 }
  0x78   : >> { %2114 = vmatpush3.bf16.msra.mxu0 %v2271_v6  ;;  %2035 = vmatprep.subr.bf16.mxu1 %v2331_v7 }
  0x79   : >> { %2115 = vmatprep.subr.bf16.mxu0 %v2331_v7 }
  0x7b   : >> { %2036 = vmatpush3.bf16.msra.mxu1 %v2272_v12  ;;  %v1477_v12 = vld [vmem:[%s2931_s6] sm:$0x1] }
  0x7c   : >> { %2116 = vmatpush3.bf16.msra.mxu0 %v2273_v14  ;;  %2041 = vmatprep.subr.bf16.mxu1 %v2331_v7 }
  0x7d   : >> { %2121 = vmatprep.subr.bf16.mxu0 %v2331_v7 }
  0x7e   : >> { %2038 = vmatmul.mubr.msk.bf16.vlgmr.msra.gmra.mrb[0].mxu1 %vm1716_vm3, %v1717_v16 }
  0x7f   : >> { %2042 = vmatpush3.bf16.msra.mxu1 %v2274_v38  ;;  %2118 = vmatmul.mubr.msk.bf16.vlgmr.msra.gmra.mrb[0].mxu0 %vm1833_vm4, %v1834_v17 }
  0x80   : >> { %2122 = vmatpush3.bf16.msra.mxu0 %v2275_v18  ;;  %2043 = vmatprep.subr.bf16.mxu1 %v2331_v7 }
  0x81   : >> { %2123 = vmatprep.subr.bf16.mxu0 %v2331_v7  ;;  %2057 = vmatprep.mubr.msk.bf16.mxu1 %vm2332_vm2, %v2331_v7 }
  0x82   : >> { %2137 = vmatprep.mubr.msk.bf16.mxu0 %vm2332_vm2, %v2331_v7 }
  0x83   : >> { %2044 = vmatpush3.bf16.msra.mxu1 %v2276_v19 }
  0x84   : >> { %2124 = vmatpush3.bf16.msra.mxu0 %v2277_v20  ;;  %2045 = vmatprep.subr.bf16.mxu1 %v2331_v7 }
  0x85   : >> { %2125 = vmatprep.subr.bf16.mxu0 %v2331_v7 }
  0x87   : >> { %2046 = vmatpush3.bf16.msra.mxu1 %v2278_v21 }
  0x88   : >> { %2126 = vmatpush3.bf16.msra.mxu0 %v2279_v22  ;;  %2047 = vmatprep.subr.bf16.mxu1 %v2331_v7 }
  0x89   : >> { %2127 = vmatprep.subr.bf16.mxu0 %v2331_v7 }
  0x8b   : >> { %2048 = vmatpush3.bf16.msra.mxu1 %v2280_v23 }
  0x8c   : >> { %2128 = vmatpush3.bf16.msra.mxu0 %v2281_v24  ;;  %2049 = vmatprep.subr.bf16.mxu1 %v2331_v7 }
  0x8d   : >> { %2129 = vmatprep.subr.bf16.mxu0 %v2331_v7 }
  0x8f   : >> { %2050 = vmatpush3.bf16.msra.mxu1 %v2282_v26 }
  0x90   : >> { %2130 = vmatpush3.bf16.msra.mxu0 %v2283_v27  ;;  %2051 = vmatprep.subr.bf16.mxu1 %v2331_v7 }
  0x91   : >> { %2131 = vmatprep.subr.bf16.mxu0 %v2331_v7 }
  0x93   : >> { %2052 = vmatpush3.bf16.msra.mxu1 %v2284_v29 }
  0x94   : >> { %2132 = vmatpush3.bf16.msra.mxu0 %v2285_v30  ;;  %2053 = vmatprep.subr.bf16.mxu1 %v2331_v7 }
  0x95   : >> { %2133 = vmatprep.subr.bf16.mxu0 %v2331_v7 }
  0x97   : >> { %2054 = vmatpush3.bf16.msra.mxu1 %v2286_v32 }
  0x98   : >> { %2134 = vmatpush3.bf16.msra.mxu0 %v2287_v33  ;;  %2055 = vmatprep.subr.bf16.mxu1 %v2331_v7 }
  0x99   : >> { %2135 = vmatprep.subr.bf16.mxu0 %v2331_v7 }
  0x9b   : >> { %2056 = vmatpush3.bf16.msra.mxu1 %v2288_v35 }
  0x9c   : >> { %2136 = vmatpush3.bf16.msra.mxu0 %v2289_v36 }
  0x9d   : >> { %2141 = vmatprep.subr.bf16.mxu0 %v2331_v7 }
  0x9e   : >> { %2058 = vmatmul.mubr.msk.bf16.vlgmr.msra.gmra.mrb[0].mxu1 %vm1746_vm7, %v1747_v37 }
  0x9f   : >> { %2138 = vmatmul.mubr.msk.bf16.vlgmr.msra.gmra.mrb[0].mxu0 %vm1862_vm8, %v1863_v39 }
  0xa0   : >> { %2142 = vmatpush3.bf16.msra.mxu0 %v2290_v43  ;;  %2157 = vmatprep.mubr.msk.bf16.mxu0 %vm2332_vm2, %v2331_v7  ;;  %vm1348_vm2 = vmand %vm326_vm1, %vm2753_vm13 }
  0xa1   : >> { %2143 = vmatprep.subr.bf16.mxu0 %v2331_v7  ;;  %vm1890_vm5 = vmpackc.low %vm1348_vm2, %vm1348_vm2 }
  0xa4   : >> { %2144 = vmatpush3.bf16.msra.mxu0 %v2291_v40 }
  0xa5   : >> { %2145 = vmatprep.subr.bf16.mxu0 %v2331_v7 }
  0xa8   : >> { %2146 = vmatpush3.bf16.msra.mxu0 %v2292_v41 }
  0xa9   : >> { %2147 = vmatprep.subr.bf16.mxu0 %v2331_v7 }
  0xac   : >> { %2148 = vmatpush3.bf16.msra.mxu0 %v2293_v42 }
  0xad   : >> { %2149 = vmatprep.subr.bf16.mxu0 %v2331_v7 }
  0xb0   : >> { %2150 = vmatpush3.bf16.msra.mxu0 %v2294_v44 }
  0xb1   : >> { %2151 = vmatprep.subr.bf16.mxu0 %v2331_v7 }
  0xb4   : >> { %2152 = vmatpush3.bf16.msra.mxu0 %v2295_v45 }
  0xb5   : >> { %2153 = vmatprep.subr.bf16.mxu0 %v2331_v7 }
  0xb8   : >> { %2154 = vmatpush3.bf16.msra.mxu0 %v2296_v46 }
  0xb9   : >> { %2155 = vmatprep.subr.bf16.mxu0 %v2331_v7 }
  0xbc   : >> { %2156 = vmatpush3.bf16.msra.mxu0 %v2297_v47 }
  0xbf   : >> { %2158 = vmatmul.mubr.msk.bf16.vlgmr.msra.gmra.mrb[0].mxu0 %vm1890_vm5, %v1891_v48 }
 0x171   : >> { %v834_v49 = vpop.f32.mrb[0].mxu1 }
 0x172   : >> { %v2059_v50 = vpop.f32.mrb[1].mxu1 }
 0x173   : >> { %v837_v51 = vpop.f32.mrb[2].mxu1 }
 0x174   : >> { %v2060_v52 = vpop.f32.mrb[3].mxu1 }
 0x192   : >> { %v1457_v53 = vpop.f32.mrb[0].mxu0 }
 0x193   : >> { %v2161_v54 = vadd.f32 %v1457_v53, %v834_v49  ;;  %v2159_v55 = vpop.f32.mrb[1].mxu0 }
 0x194   : >> { %v1460_v7 = vpop.f32.mrb[2].mxu0 }
 0x195   : >> { %v1464_v56 = vpack.c.bf16 %v2161_v54, %v2161_v54  ;;  %v1469_v57 = vrot.slane %v2161_v54, 4  ;;  %v1478_v58 = vmul.f32 %v2161_v54, %v2161_v54  ;;  %v2160_v59 = vpop.f32.mrb[3].mxu0 }
 0x197   : >> { %1467 = vst [vmem:[%s1466_s28] sm:$0xf] %v1464_v56  ;;  %v1470_v60 = vadd.f32 %v2161_v54, %v1469_v57  ;;  %v1479_v61 = vrot.slane %v1478_v58, 4 }
 0x199   : >> { %v1471_v62 = vrot.slane %v1470_v60, 2  ;;  %v1480_v63 = vadd.f32 %v1479_v61, %v1478_v58 }
 0x19b   : >> { %v1472_v0 = vadd.f32 %v1471_v62, %v1470_v60  ;;  %v1481_v3 = vrot.slane %v1480_v63, 2 }
 0x19d   : >> { %v1473_v6 = vrot.slane %v1472_v0, 1  ;;  %v1482_v8 = vadd.f32 %v1481_v3, %v1480_v63 }
 0x19f   : >> { %v1474_v10 = vadd.f32 %v1473_v6, %v1472_v0  ;;  %v1483_v11 = vrot.slane %v1482_v8, 1  ;;  %332 = sbr.rel (!%p330_p1) target bundleno = 29 (0x1d), region = 116 }
 0x1a1   : >> { %v1475_v13 = vadd.f32 %v1474_v10, %v1468_v9  ;;  %v1484_v14 = vadd.f32 %v1483_v11, %v1482_v8 }
 0x1a3   : >> { %1476 = vst [vmem:[%s2930_s5] sm:$0x1] %v1475_v13  ;;  %v1485_v15 = vadd.f32 %v1484_v14, %v1477_v12 }
 0x1a5   : >> { %1486 = vst [vmem:[%s2931_s6] sm:$0x1] %v1485_v15 }
 0x1a6 PF: > { %s17_s23 = sadd.s32 1, %s2324_s23   ;;  %s2943_s21 = smov %s2320_s22 }
 0x1a7   : > { %p14_p2 = scmp.ge.s32.totalorder %s17_s23, 4   ;;  %s2944_s22 = smov %s2946_s24 }
 0x1a9   :  { %16 = sbr.rel (!%p14_p2) target bundleno = 2 (0x2), region = 127 }

</bundles_post_ra>
